<compile_context>
chip_gen: v7x
topology: tpu7x:2x2x1
jax: 0.10.0
libtpu: 0.0.40
codegen_flags: <defaults>
</compile_context>

<pallas_src>
import functools

import jax
import jax.numpy as jnp
import numpy as np
from jax import lax
from jax.experimental import pallas as pl
from jax.experimental.pallas import tpu as pltpu


# ----------------------------------------------------------------------------
# Pallas kernel: (conv-as-dense-matmul + bias + ReLU) -> fc_hidden + ReLU ->
# output.  One grid step processes a TB-sized batch tile; weights resident.
# ----------------------------------------------------------------------------
def net_kernel(x_ref, wcb_ref, bcb_ref, w1_ref, b1_ref, w2_ref, b2_ref,
               out_ref):
    # x_ref:  (TB, C*100)    wcb_ref: (C*100, 1024)   bcb_ref: (1, 1024)
    # w1_ref: (1024, 128)    b1_ref:  (1, 128)
    # w2_ref: (128, A_pad)   b2_ref:  (1, A_pad)      out_ref: (TB, A_pad)

    # Conv folded into one dense MXU matmul; bias/ReLU on the lane-dense,
    # already-flattened (channel-major, PyTorch-order) view.
    conv = jnp.dot(x_ref[...], wcb_ref[...],
                   preferred_element_type=jnp.float32)          # (TB, 1024)
    flat = jnp.maximum(conv + bcb_ref[...], 0.0)

    # fc_hidden + ReLU.
    h = jnp.dot(flat, w1_ref[...], preferred_element_type=jnp.float32)
    h = jnp.maximum(h + b1_ref[...], 0.0)                       # (TB, 128)

    # Output layer (lane-dense padded width, unmasked stores).
    out_ref[...] = (jnp.dot(h, w2_ref[...],
                            preferred_element_type=jnp.float32)
                    + b2_ref[...])                              # (TB, A_pad)


# ----------------------------------------------------------------------------
# One-time weight preparation (hoisted out of the per-forward hot path).
# ----------------------------------------------------------------------------
def prepare_params(params, height=10, width=10):
    wc, bc, w1, b1, w2, b2 = (params[k] for k in
                              ('wc', 'bc', 'w1', 'b1', 'w2', 'b2'))
    OC, C, KH, KW = wc.shape                       # (16, obs_size, 3, 3)
    Ho, Wo = height - KH + 1, width - KW + 1       # 8, 8
    P = Ho * Wo                                    # 64
    HID = w1.shape[0]                              # 128
    A = w2.shape[0]
    A_pad = max(128, ((A + 127) // 128) * 128)     # lane-dense output width

    # --- conv unrolled into a dense matmul weight -----------------------
    # Wc_big[c*H*W + ih*W + iw, oc*P + oh*Wo + ow] = wc[oc, c, kh, kw]
    # with ih = oh + kh, iw = ow + kw  (stride 1, VALID padding).
    wc_np = np.asarray(wc, np.float32)
    wbig = np.zeros((C, height, width, OC, Ho, Wo), np.float32)
    for kh in range(KH):
        for kw in range(KW):
            w_k = wc_np[:, :, kh, kw].T            # (C, OC)
            for oh in range(Ho):
                for ow in range(Wo):
                    wbig[:, oh + kh, ow + kw, :, oh, ow] = w_k
    wc_big = jnp.asarray(wbig.reshape(C * height * width, OC * P))

    # Conv bias expanded to the channel-major flattened layout (oc*P + p).
    bc_big = jnp.asarray(
        np.repeat(np.asarray(bc, np.float32), P).reshape(1, OC * P))

    # fc_hidden: flatten order matches PyTorch exactly -> plain transpose.
    w1_t = jnp.asarray(w1, jnp.float32).T          # (1024, 128)
    b1_r = jnp.asarray(b1, jnp.float32).reshape(1, HID)

    # Output layer, zero-padded to a lane-dense width.
    w2_p = jnp.zeros((HID, A_pad), jnp.float32).at[:, :A].set(
        jnp.asarray(w2, jnp.float32).T)
    b2_p = jnp.zeros((1, A_pad), jnp.float32).at[:, :A].set(
        jnp.asarray(b2, jnp.float32).reshape(1, A))

    return {'wc': wc_big, 'bc': bc_big, 'w1': w1_t, 'b1': b1_r,
            'w2': w2_p, 'b2': b2_p}


# ----------------------------------------------------------------------------
# Batch tiling helpers.
# ----------------------------------------------------------------------------
def _round_up(n, m):
    return ((n + m - 1) // m) * m


def _batch_tile(B):
    """Large tiles amortize the ~0.35us/step pipeline overhead; for B > 16 use
    >= 2 grid steps so "parallel" can shard the batch over v7x's two TCs."""
    if B <= 16:
        return B                                   # single tile, no padding
    return min(256, _round_up(-(-B // 2), 8))      # 2..N steps, TB multiple of 8


# ----------------------------------------------------------------------------
# Forward wrapper: one fused pallas_call per forward (im2col fully eliminated).
# ----------------------------------------------------------------------------
@functools.partial(jax.jit, static_argnames=("action_size",))
def net_forward_pallas(x, prep, *, action_size):
    """x: (B, obs_size, 10, 10) f32 -> (B, action_size) f32."""
    B, C, H, W = x.shape
    K = C * H * W                                  # 400
    OUT = prep['wc'].shape[1]                      # 1024
    HID = prep['w1'].shape[1]                      # 128
    A_pad = prep['w2'].shape[1]

    x_flat = x.reshape(B, K)                       # contiguous -> free bitcast

    TB = _batch_tile(B)
    B_pad = _round_up(B, TB)
    if B_pad != B:                                 # pad batch to a tile multiple
        x_flat = jnp.concatenate(
            [x_flat, jnp.zeros((B_pad - B, K), x_flat.dtype)], axis=0)
    grid = (B_pad // TB,)

    flops = int(2 * B_pad * (K * OUT + OUT * HID + HID * A_pad))
    bytes_accessed = int(4 * (B_pad * K + K * OUT + OUT * HID + HID * A_pad
                              + B_pad * A_pad))

    out_padded = pl.pallas_call(
        net_kernel,
        out_shape=jax.ShapeDtypeStruct((B_pad, A_pad), jnp.float32),
        grid=grid,
        in_specs=[
            pl.BlockSpec((TB, K), lambda i: (i, 0)),        # batch tile of x
            pl.BlockSpec((K, OUT), lambda i: (0, 0)),       # resident weights
            pl.BlockSpec((1, OUT), lambda i: (0, 0)),
            pl.BlockSpec((OUT, HID), lambda i: (0, 0)),
            pl.BlockSpec((1, HID), lambda i: (0, 0)),
            pl.BlockSpec((HID, A_pad), lambda i: (0, 0)),
            pl.BlockSpec((1, A_pad), lambda i: (0, 0)),
        ],
        out_specs=pl.BlockSpec((TB, A_pad), lambda i: (i, 0)),
        compiler_params=pltpu.CompilerParams(
            dimension_semantics=("parallel",)),
        cost_estimate=pl.CostEstimate(
            flops=flops, transcendentals=0, bytes_accessed=bytes_accessed),
    )(x_flat, prep['wc'], prep['bc'], prep['w1'], prep['b1'],
      prep['w2'], prep['b2'])

    return out_padded[:B, :action_size]


# ----------------------------------------------------------------------------
# Pure-JAX reference (mirrors the PyTorch forward exactly) for verification.
# ----------------------------------------------------------------------------
@jax.jit
def net_forward_ref(x, params):
    wc, bc, w1, b1, w2, b2 = (params[k] for k in
                              ('wc', 'bc', 'w1', 'b1', 'w2', 'b2'))
    conv = lax.conv_general_dilated(
        x, wc, window_strides=(1, 1), padding='VALID',
        dimension_numbers=('NCHW', 'OIHW', 'NCHW'))
    conv = jnp.maximum(conv + bc.reshape(1, 16, 1, 1), 0.0)
    flat = conv.reshape(x.shape[0], -1)            # channel-major (PyTorch view)
    h = jnp.maximum(flat @ w1.T + b1, 0.0)
    return h @ w2.T + b2


def init_params(key, obs_size, action_size):
    num_linear_units = 8 * 8 * 16                  # size_linear_unit(10)^2 * 16
    ks = jax.random.split(key, 6)
    scale = 0.1
    return {
        'wc': scale * jax.random.normal(ks[0], (16, obs_size, 3, 3), jnp.float32),
        'bc': scale * jax.random.normal(ks[1], (16,), jnp.float32),
        'w1': scale * jax.random.normal(ks[2], (128, num_linear_units), jnp.float32),
        'b1': scale * jax.random.normal(ks[3], (128,), jnp.float32),
        'w2': scale * jax.random.normal(ks[4], (action_size, 128), jnp.float32),
        'b2': scale * jax.random.normal(ks[5], (action_size,), jnp.float32),
    }


if __name__ == "__main__":
    key = jax.random.PRNGKey(0)
    k_param, k_x, k_x2 = jax.random.split(key, 3)

    obs_size, action_size = 4, 6                   # MinAtar: 10x10 board
    params = init_params(k_param, obs_size, action_size)
    prep = prepare_params(params)                  # one-time relayout/pad/unroll

    # Both sides go through the MXU at default matmul precision, so they commit
    # matching per-product rounding; 1e-3 gives ample margin over the observed
    # ~1e-5 discrepancy while still catching any layout/permutation bug.
    tol = dict(rtol=1e-3, atol=1e-3)

    # Small batch (single tile, grid=1).
    batch = 2
    x = jax.random.normal(k_x, (batch, obs_size, 10, 10), jnp.float32)
    out = jax.block_until_ready(net_forward_pallas(x, prep, action_size=action_size))
    ref = jax.block_until_ready(net_forward_ref(x, params))
    assert out.shape == (batch, action_size)
    assert np.allclose(np.asarray(out), np.asarray(ref), **tol)

    # Larger, non-divisible batch: exercises batch padding + multi-step grid
    # (the v7x two-TensorCore path).
    batch2 = 33
    x2 = jax.random.normal(k_x2, (batch2, obs_size, 10, 10), jnp.float32)
    out2 = jax.block_until_ready(net_forward_pallas(x2, prep, action_size=action_size))
    ref2 = jax.block_until_ready(net_forward_ref(x2, params))
    assert out2.shape == (batch2, action_size)
    assert np.allclose(np.asarray(out2), np.asarray(ref2), **tol)

    print("KERNEL_OK")
</pallas_src>

<mosaic_0001>
module attributes {stable_mosaic.version = 11 : i64} {
  func.func @net_kernel(%arg0: i32, %arg1: memref<2x400xf32, #tpu.memory_space<vmem>>, %arg2: memref<400x1024xf32, #tpu.memory_space<vmem>>, %arg3: memref<1x1024xf32, #tpu.memory_space<vmem>>, %arg4: memref<1024x128xf32, #tpu.memory_space<vmem>>, %arg5: memref<1x128xf32, #tpu.memory_space<vmem>>, %arg6: memref<128x128xf32, #tpu.memory_space<vmem>>, %arg7: memref<1x128xf32, #tpu.memory_space<vmem>>, %arg8: memref<2x128xf32, #tpu.memory_space<vmem>>) attributes {dimension_semantics = [#tpu.dimension_semantics<parallel>], iteration_bounds = array<i64: 1>, scalar_prefetch = 0 : i64, scratch_operands = 0 : i64, tpu.core_type = #tpu.core_type<tc>, window_params = [{transform_indices = @transform_0, window_bounds = array<i64: 2, 400>}, {pipeline_mode = #tpu.pipeline_mode<synchronous>, transform_indices = @transform_1, window_bounds = array<i64: 400, 1024>}, {pipeline_mode = #tpu.pipeline_mode<synchronous>, transform_indices = @transform_2, window_bounds = array<i64: 1, 1024>}, {pipeline_mode = #tpu.pipeline_mode<synchronous>, transform_indices = @transform_3, window_bounds = array<i64: 1024, 128>}, {pipeline_mode = #tpu.pipeline_mode<synchronous>, transform_indices = @transform_4, window_bounds = array<i64: 1, 128>}, {pipeline_mode = #tpu.pipeline_mode<synchronous>, transform_indices = @transform_5, window_bounds = array<i64: 128, 128>}, {pipeline_mode = #tpu.pipeline_mode<synchronous>, transform_indices = @transform_6, window_bounds = array<i64: 1, 128>}, {transform_indices = @transform_7, window_bounds = array<i64: 2, 128>}]} {
    %c0 = arith.constant 0 : index
    %c0_0 = arith.constant 0 : index
    %0 = vector.load %arg1[%c0, %c0_0] : memref<2x400xf32, #tpu.memory_space<vmem>>, vector<2x400xf32>
    %c0_1 = arith.constant 0 : index
    %c0_2 = arith.constant 0 : index
    %1 = vector.load %arg2[%c0_1, %c0_2] : memref<400x1024xf32, #tpu.memory_space<vmem>>, vector<400x1024xf32>
    %cst = arith.constant dense<0.000000e+00> : vector<2x1024xf32>
    %2 = tpu.matmul %0, %1, %cst {dimension_numbers = #tpu.dot_dimension_numbers<[1], [0], [0], [1], [0, 0, 1, 1], [], []>} : vector<2x400xf32>, vector<400x1024xf32>, vector<2x1024xf32> -> vector<2x1024xf32>
    %c0_3 = arith.constant 0 : index
    %c0_4 = arith.constant 0 : index
    %3 = vector.load %arg3[%c0_3, %c0_4] : memref<1x1024xf32, #tpu.memory_space<vmem>>, vector<1x1024xf32>
    %4 = vector.broadcast %3 : vector<1x1024xf32> to vector<2x1024xf32>
    %5 = arith.addf %2, %4 : vector<2x1024xf32>
    %cst_5 = arith.constant 0.000000e+00 : f32
    %6 = vector.broadcast %cst_5 : f32 to vector<2x1024xf32>
    %7 = arith.maximumf %5, %6 : vector<2x1024xf32>
    %c0_6 = arith.constant 0 : index
    %c0_7 = arith.constant 0 : index
    %8 = vector.load %arg4[%c0_6, %c0_7] : memref<1024x128xf32, #tpu.memory_space<vmem>>, vector<1024x128xf32>
    %cst_8 = arith.constant dense<0.000000e+00> : vector<2x128xf32>
    %9 = tpu.matmul %7, %8, %cst_8 {dimension_numbers = #tpu.dot_dimension_numbers<[1], [0], [0], [1], [0, 0, 1, 1], [], []>} : vector<2x1024xf32>, vector<1024x128xf32>, vector<2x128xf32> -> vector<2x128xf32>
    %c0_9 = arith.constant 0 : index
    %c0_10 = arith.constant 0 : index
    %10 = vector.load %arg5[%c0_9, %c0_10] : memref<1x128xf32, #tpu.memory_space<vmem>>, vector<1x128xf32>
    %11 = vector.broadcast %10 : vector<1x128xf32> to vector<2x128xf32>
    %12 = arith.addf %9, %11 : vector<2x128xf32>
    %cst_11 = arith.constant 0.000000e+00 : f32
    %13 = vector.broadcast %cst_11 : f32 to vector<2x128xf32>
    %14 = arith.maximumf %12, %13 : vector<2x128xf32>
    %c0_12 = arith.constant 0 : index
    %c0_13 = arith.constant 0 : index
    %15 = vector.load %arg6[%c0_12, %c0_13] : memref<128x128xf32, #tpu.memory_space<vmem>>, vector<128x128xf32>
    %cst_14 = arith.constant dense<0.000000e+00> : vector<2x128xf32>
    %16 = tpu.matmul %14, %15, %cst_14 {dimension_numbers = #tpu.dot_dimension_numbers<[1], [0], [0], [1], [0, 0, 1, 1], [], []>} : vector<2x128xf32>, vector<128x128xf32>, vector<2x128xf32> -> vector<2x128xf32>
    %c0_15 = arith.constant 0 : index
    %c0_16 = arith.constant 0 : index
    %17 = vector.load %arg7[%c0_15, %c0_16] : memref<1x128xf32, #tpu.memory_space<vmem>>, vector<1x128xf32>
    %18 = vector.broadcast %17 : vector<1x128xf32> to vector<2x128xf32>
    %19 = arith.addf %16, %18 : vector<2x128xf32>
    %c0_17 = arith.constant 0 : index
    %c0_18 = arith.constant 0 : index
    %20 = vector.load %arg8[%c0_17, %c0_18] : memref<2x128xf32, #tpu.memory_space<vmem>>, vector<2x128xf32>
    tpu.vector_store %arg8[%c0_17, %c0_18], %19 {strides = array<i32>} : memref<2x128xf32, #tpu.memory_space<vmem>>, vector<2x128xf32>,
    return
  }
  func.func @transform_0(%arg0: i32) -> (i32, i32) {
    %c0_i32 = arith.constant 0 : i32
    %c0_i32_0 = arith.constant 0 : i32
    return %arg0, %c0_i32 : i32, i32
  }
  func.func @transform_1(%arg0: i32) -> (i32, i32) {
    %c0_i32 = arith.constant 0 : i32
    %c0_i32_0 = arith.constant 0 : i32
    %c0_i32_1 = arith.constant 0 : i32
    return %c0_i32, %c0_i32_0 : i32, i32
  }
  func.func @transform_2(%arg0: i32) -> (i32, i32) {
    %c0_i32 = arith.constant 0 : i32
    %c0_i32_0 = arith.constant 0 : i32
    %c0_i32_1 = arith.constant 0 : i32
    return %c0_i32, %c0_i32_0 : i32, i32
  }
  func.func @transform_3(%arg0: i32) -> (i32, i32) {
    %c0_i32 = arith.constant 0 : i32
    %c0_i32_0 = arith.constant 0 : i32
    %c0_i32_1 = arith.constant 0 : i32
    return %c0_i32, %c0_i32_0 : i32, i32
  }
  func.func @transform_4(%arg0: i32) -> (i32, i32) {
    %c0_i32 = arith.constant 0 : i32
    %c0_i32_0 = arith.constant 0 : i32
    %c0_i32_1 = arith.constant 0 : i32
    return %c0_i32, %c0_i32_0 : i32, i32
  }
  func.func @transform_5(%arg0: i32) -> (i32, i32) {
    %c0_i32 = arith.constant 0 : i32
    %c0_i32_0 = arith.constant 0 : i32
    %c0_i32_1 = arith.constant 0 : i32
    return %c0_i32, %c0_i32_0 : i32, i32
  }
  func.func @transform_6(%arg0: i32) -> (i32, i32) {
    %c0_i32 = arith.constant 0 : i32
    %c0_i32_0 = arith.constant 0 : i32
    %c0_i32_1 = arith.constant 0 : i32
    return %c0_i32, %c0_i32_0 : i32, i32
  }
  func.func @transform_7(%arg0: i32) -> (i32, i32) {
    %c0_i32 = arith.constant 0 : i32
    %c0_i32_0 = arith.constant 0 : i32
    return %arg0, %c0_i32 : i32, i32
  }
}

</mosaic_0001>

<bundles_post_ra>
// kernel: net_forward_pallas.1
= control target key start
LH: loop header
LB: loop body
LE: loop exit
PB: predicated region body
PF: predicated region fallthrough
CT: control target
= control target key end

     0   :  { %12 = vsyncpa [#allocation3], 0  ;;  %s2824_s0 = inlined_call_operand.vmem [shape: f32[2,400], index: 0, kind: input, shape index: {}]   ;;  %s2825_s1 = inlined_call_operand.hbm [shape: f32[400,1024], index: 1, kind: input, shape index: {}]   ;;  %s2826_s2 = inlined_call_operand.hbm [shape: f32[1,1024], index: 2, kind: input, shape index: {}]   ;;  %s2827_s3 = inlined_call_operand.hbm [shape: f32[1024,128], index: 3, kind: input, shape index: {}]   ;;  %s2828_s4 = inlined_call_operand.hbm [shape: f32[1,128], index: 4, kind: input, shape index: {}]   ;;  %s2829_s5 = inlined_call_operand.hbm [shape: f32[128,128], index: 5, kind: input, shape index: {}]   ;;  %s2830_s6 = inlined_call_operand.hbm [shape: f32[1,128], index: 6, kind: input, shape index: {}]   ;;  %s2831_s7 = inlined_call_operand.hbm [shape: f32[2,128], index: 7, kind: output, shape index: {}]  }
   0x1   :  { %13 = vsyncpa [#allocation6], 0 }
   0x2   :  { %14 = vsyncpa [#allocation9], 0 }
   0x3   :  { %15 = vsyncpa [#allocation12], 0 }
   0x4   :  { %16 = vsyncpa [#allocation4], 0  ;;  %s2620_s24 = smov [#allocation5]   ;;  %s2621_s26 = smov [#allocation8]  }
   0x5   :  { %s37_s25 = sshll.u32 %s2620_s24, 4  ;;  %s59_s27 = sshll.u32 %s2621_s26, 4  ;;  %s38_s25 = int_to_ptr.vmem [resolvable:$true] %s37_s25  ;;  %s60_s27 = int_to_ptr.vmem [resolvable:$true] %s59_s27 }
   0x6   :  { %s2456_s30 = scalar_lea.hbm %s2826_s2, 128 }
   0x7   :  { %p2457_p0 = scmp.ne.s32.totalorder %s2826_s2, %s2456_s30  ;;  %p2460_p1 = scmp.lt.u32.totalorder %s2456_s30, %s2826_s2 }
   0x9   :  { %p2462_p2 = pnand %p2460_p1, %p2457_p0 }
   0xb   :  { %2465 = shalt.err (!%p2462_p2)
}
   0xc   :  { %s2466_s12 = scalar_lea.vmem %s38_s25, 128  ;;  %p2471_p4 = scmp.lt.s32.totalorder %s38_s25, %s38_s25 }
   0xd   :  { %p2467_p3 = scmp.ne.s32.totalorder %s38_s25, %s2466_s12  ;;  %p2472_p5 = scmp.lt.s32.totalorder %s2466_s12, %s2466_s12 }
   0xf   :  { %p2473_p6 = por %p2472_p5, %p2471_p4 }
  0x11   :  { %p2474_p7 = pnand %p2473_p6, %p2467_p3 }
  0x13   :  { %2477 = shalt.err (!%p2474_p7)
}
  0x14   :  { %40 = dma.hbm_to_vmem [thread:$0]  %s2826_s2, 128, %s38_s25, [#allocation6]  }
  0x15   :  { %s2478_s17 = scalar_lea.hbm %s2828_s4, 16 }
  0x16   :  { %p2479_p8 = scmp.ne.s32.totalorder %s2828_s4, %s2478_s17  ;;  %p2482_p9 = scmp.lt.u32.totalorder %s2478_s17, %s2828_s4 }
  0x18   :  { %p2484_p10 = pnand %p2482_p9, %p2479_p8 }
  0x1a   :  { %2487 = shalt.err (!%p2484_p10)
}
  0x1b   :  { %s2488_s22 = scalar_lea.vmem %s60_s27, 16  ;;  %s2492_s23 = scalar_lea.vmem %s60_s27, 32 }
  0x1c   :  { %p2489_p11 = scmp.ne.s32.totalorder %s60_s27, %s2488_s22  ;;  %p2493_p12 = scmp.lt.s32.totalorder %s60_s27, %s60_s27 }
  0x1d   :  { %p2494_p13 = scmp.lt.s32.totalorder %s2492_s23, %s2488_s22 }
  0x1f   :  { %p2495_p0 = por %p2494_p13, %p2493_p12 }
  0x21   :  { %p2496_p1 = pnand %p2495_p0, %p2489_p11 }
  0x23   :  { %2499 = shalt.err (!%p2496_p1)
}
  0x24   :  { %62 = dma.hbm_to_vmem [thread:$0]  %s2828_s4, 16, %s60_s27, [#allocation9]  }
  0x25   :  { %s2622_s25 = smov [#allocation2]   ;;  %s2500_s30 = scalar_lea.hbm %s2825_s1, 51200 }
  0x26   :  { %s24_s26 = sshll.u32 %s2622_s25, 4  ;;  %p2501_p2 = scmp.ne.s32.totalorder %s2825_s1, %s2500_s30  ;;  %s25_s26 = int_to_ptr.vmem [resolvable:$true] %s24_s26 }
  0x27   :  { %p2504_p3 = scmp.lt.u32.totalorder %s2500_s30, %s2825_s1 }
  0x29   :  { %p2506_p4 = pnand %p2504_p3, %p2501_p2 }
  0x2b   :  { %2509 = shalt.err (!%p2506_p4)
}
  0x2c   :  { %s2510_s12 = scalar_lea.vmem %s25_s26, 51200  ;;  %p2515_p6 = scmp.lt.s32.totalorder %s25_s26, %s25_s26 }
  0x2d   :  { %p2511_p5 = scmp.ne.s32.totalorder %s25_s26, %s2510_s12  ;;  %p2516_p7 = scmp.lt.s32.totalorder %s2510_s12, %s2510_s12 }
  0x2f   :  { %p2517_p8 = por %p2516_p7, %p2515_p6 }
  0x31   :  { %p2518_p9 = pnand %p2517_p8, %p2511_p5 }
  0x33   :  { %2521 = shalt.err (!%p2518_p9)
}
  0x34   :  { %s2623_s4 = smov 1024   ;;  %s2624_s27 = smov 64  }
  0x35   :  { %30 = dma.hbm_to_vmem [thread:$0]  %s2825_s1, 51200, %s25_s26, [#allocation3], %s2623_s4, %s2623_s4, %s2624_s27  }
  0x36   :  { %s2625_s15 = smov [#allocation7]   ;;  %s2522_s19 = scalar_lea.hbm %s2827_s3, 16384 }
  0x37   :  { %s46_s16 = sshll.u32 %s2625_s15, 4  ;;  %p2523_p10 = scmp.ne.s32.totalorder %s2827_s3, %s2522_s19  ;;  %s47_s16 = int_to_ptr.vmem [resolvable:$true] %s46_s16 }
  0x38   :  { %p2526_p11 = scmp.lt.u32.totalorder %s2522_s19, %s2827_s3 }
  0x3a   :  { %p2528_p12 = pnand %p2526_p11, %p2523_p10 }
  0x3c   :  { %2531 = shalt.err (!%p2528_p12)
}
  0x3d   :  { %s2532_s2 = scalar_lea.vmem %s47_s16, 16384  ;;  %p2537_p0 = scmp.lt.s32.totalorder %s47_s16, %s47_s16 }
  0x3e   :  { %p2533_p13 = scmp.ne.s32.totalorder %s47_s16, %s2532_s2  ;;  %p2538_p1 = scmp.lt.s32.totalorder %s2532_s2, %s2532_s2 }
  0x40   :  { %p2539_p2 = por %p2538_p1, %p2537_p0 }
  0x42   :  { %p2540_p3 = pnand %p2539_p2, %p2533_p13 }
  0x44   :  { %2543 = shalt.err (!%p2540_p3)
}
  0x45   :  { %s2626_s1 = smov 128   ;;  %s2627_s24 = smov 8  }
  0x46   :  { %52 = dma.hbm_to_vmem [thread:$0]  %s2827_s3, 16384, %s47_s16, [#allocation6], %s2626_s1, %s2626_s1, %s2627_s24  }
  0x47   :  { %s2628_s28 = smov [#allocation10]   ;;  %s2629_s30 = smov [#allocation11]  }
  0x48   :  { %s68_s29 = sshll.u32 %s2628_s28, 4  ;;  %s81_s8 = sshll.u32 %s2629_s30, 4  ;;  %s69_s29 = int_to_ptr.vmem [resolvable:$true] %s68_s29  ;;  %s82_s8 = int_to_ptr.vmem [resolvable:$true] %s81_s8 }
  0x49   :  { %s2544_s11 = scalar_lea.hbm %s2829_s5, 2048 }
  0x4a   :  { %p2545_p4 = scmp.ne.s32.totalorder %s2829_s5, %s2544_s11  ;;  %p2548_p5 = scmp.lt.u32.totalorder %s2544_s11, %s2829_s5 }
  0x4c   :  { %p2550_p6 = pnand %p2548_p5, %p2545_p4 }
  0x4e   :  { %2553 = shalt.err (!%p2550_p6)
}
  0x4f   :  { %s2554_s3 = scalar_lea.vmem %s69_s29, 2048  ;;  %p2559_p8 = scmp.lt.s32.totalorder %s69_s29, %s69_s29 }
  0x50   :  { %p2555_p7 = scmp.ne.s32.totalorder %s69_s29, %s2554_s3  ;;  %p2560_p9 = scmp.lt.s32.totalorder %s2554_s3, %s2554_s3 }
  0x52   :  { %p2561_p10 = por %p2560_p9, %p2559_p8 }
  0x54   :  { %p2562_p11 = pnand %p2561_p10, %p2555_p7 }
  0x56   :  { %2565 = shalt.err (!%p2562_p11)
}
  0x57   :  { %74 = dma.hbm_to_vmem [thread:$0]  %s2829_s5, 2048, %s69_s29, [#allocation9], %s2626_s1, %s2626_s1, %s2627_s24  }
  0x58   :  { %s2566_s18 = scalar_lea.hbm %s2830_s6, 16 }
  0x59   :  { %p2567_p12 = scmp.ne.s32.totalorder %s2830_s6, %s2566_s18  ;;  %p2570_p13 = scmp.lt.u32.totalorder %s2566_s18, %s2830_s6 }
  0x5b   :  { %p2572_p0 = pnand %p2570_p13, %p2567_p12 }
  0x5d   :  { %2575 = shalt.err (!%p2572_p0)
}
  0x5e   :  { %s2576_s23 = scalar_lea.vmem %s82_s8, 16  ;;  %s2580_s2 = scalar_lea.vmem %s82_s8, 32 }
  0x5f   :  { %p2577_p1 = scmp.ne.s32.totalorder %s82_s8, %s2576_s23  ;;  %p2581_p2 = scmp.lt.s32.totalorder %s82_s8, %s82_s8 }
  0x60   :  { %p2582_p3 = scmp.lt.s32.totalorder %s2580_s2, %s2576_s23 }
  0x62   :  { %p2583_p4 = por %p2582_p3, %p2581_p2 }
  0x64   :  { %p2584_p5 = pnand %p2583_p4, %p2577_p1 }
  0x66   :  { %2587 = shalt.err (!%p2584_p5)
}
  0x67   :  { %84 = dma.hbm_to_vmem [thread:$0]  %s2830_s6, 16, %s82_s8, [#allocation12]  }
  0x68   :  { %2610 = dma.done.wait [#allocation3], 51200  }
  0x69   :  { %2611 = vsyncadd [#allocation3], 4294916096 }
  0x6a   :  { %2612 = dma.done.wait [#allocation6], 16512  }
  0x6b   :  { %2613 = vsyncadd [#allocation6], 4294950784 }
  0x6c   :  { %2614 = dma.done.wait [#allocation9], 2064  }
  0x6d   :  { %2615 = vsyncadd [#allocation9], 4294965232 }
  0x6e   :  { %2616 = dma.done.wait [#allocation12], 16  }
  0x6f   :  { %2617 = vsyncadd [#allocation12], 4294967280  ;;  %v105_v0 = vld [vmem:[#allocation2 + $0x8] sm:$0xff]  ;;  %v107_v2 = vld [vmem:[#allocation2 + $0x18] sm:$0xff]  ;;  %vm567_vm0 = vcmask 130048   ;;  %vm2632_vm1 = vmmov 0  }
  0x70   :  { %v113_v1 = vld [vmem:[#allocation2 + $0x48] sm:$0xff]  ;;  %v115_v4 = vld [vmem:[#allocation2 + $0x58] sm:$0xff]  ;;  %v104_v5 = vld [vmem:[#allocation2] sm:$0xff] }
  0x71   :  { %v1872_v3 = vpack.c.bf16 %v113_v1, %v105_v0  ;;  %v112_v6 = vld [vmem:[#allocation2 + $0x40] sm:$0xff]  ;;  %v1972_v7 = vpack.c.bf16 %v115_v4, %v107_v2  ;;  %v106_v9 = vld [vmem:[#allocation2 + $0x10] sm:$0xff]  ;;  %v121_v11 = vld [vmem:[#allocation2 + $0x88] sm:$0xff] }
  0x72   :  { %v1874_v8 = vpack.c.bf16 %v112_v6, %v104_v5  ;;  %v114_v10 = vld [vmem:[#allocation2 + $0x50] sm:$0xff]  ;;  %v129_v13 = vld [vmem:[#allocation2 + $0xc8] sm:$0xff]  ;;  %v123_v14 = vld [vmem:[#allocation2 + $0x98] sm:$0xff] }
  0x73   :  { %1873 = vmatprep.subr.bf16.mxu0 %v1872_v3  ;;  %v1974_v12 = vpack.c.bf16 %v114_v10, %v106_v9  ;;  %v131_v15 = vld [vmem:[#allocation2 + $0xd8] sm:$0xff]  ;;  %1973 = vmatprep.subr.bf16.mxu1 %v1972_v7  ;;  %v1876_v16 = vpack.c.bf16 %v129_v13, %v121_v11  ;;  %v120_v18 = vld [vmem:[#allocation2 + $0x80] sm:$0xff]  ;;  %v122_v20 = vld [vmem:[#allocation2 + $0x90] sm:$0xff] }
  0x74   :  { %1875 = vmatpush1.bf16.msra.mxu0 %v1874_v8  ;;  %v1976_v17 = vpack.c.bf16 %v131_v15, %v123_v14  ;;  %v128_v19 = vld [vmem:[#allocation2 + $0xc0] sm:$0xff]  ;;  %v130_v22 = vld [vmem:[#allocation2 + $0xd0] sm:$0xff]  ;;  %v137_v23 = vld [vmem:[#allocation2 + $0x108] sm:$0xff] }
  0x75   :  { %1975 = vmatpush1.bf16.msra.mxu1 %v1974_v12  ;;  %v1878_v21 = vpack.c.bf16 %v128_v19, %v120_v18  ;;  %v145_v24 = vld [vmem:[#allocation2 + $0x148] sm:$0xff]  ;;  %1877 = vmatprep.subr.bf16.mxu0 %v1876_v16  ;;  %v1978_v25 = vpack.c.bf16 %v130_v22, %v122_v20  ;;  %v139_v27 = vld [vmem:[#allocation2 + $0x118] sm:$0xff]  ;;  %v136_v29 = vld [vmem:[#allocation2 + $0x100] sm:$0xff] }
  0x76   :  { %1977 = vmatprep.subr.bf16.mxu1 %v1976_v17  ;;  %v1880_v26 = vpack.c.bf16 %v145_v24, %v137_v23  ;;  %v147_v28 = vld [vmem:[#allocation2 + $0x158] sm:$0xff]  ;;  %v144_v31 = vld [vmem:[#allocation2 + $0x140] sm:$0xff]  ;;  %v138_v32 = vld [vmem:[#allocation2 + $0x110] sm:$0xff] }
  0x77   :  { %v1980_v30 = vpack.c.bf16 %v147_v28, %v139_v27  ;;  %v146_v33 = vld [vmem:[#allocation2 + $0x150] sm:$0xff]  ;;  %v1882_v34 = vpack.c.bf16 %v144_v31, %v136_v29  ;;  %v153_v35 = vld [vmem:[#allocation2 + $0x188] sm:$0xff]  ;;  %v155_v37 = vld [vmem:[#allocation2 + $0x198] sm:$0xff] }
  0x78   :  { %1879 = vmatpush1.bf16.msra.mxu0 %v1878_v21  ;;  %v161_v36 = vld [vmem:[#allocation2 + $0x1c8] sm:$0xff]  ;;  %v1982_v38 = vpack.c.bf16 %v146_v33, %v138_v32  ;;  %v163_v40 = vld [vmem:[#allocation2 + $0x1d8] sm:$0xff]  ;;  %v152_v41 = vld [vmem:[#allocation2 + $0x180] sm:$0xff] }
  0x79   :  { %1979 = vmatpush1.bf16.msra.mxu1 %v1978_v25  ;;  %1881 = vmatprep.subr.bf16.mxu0 %v1880_v26  ;;  %v1884_v39 = vpack.c.bf16 %v161_v36, %v153_v35  ;;  %v160_v42 = vld [vmem:[#allocation2 + $0x1c0] sm:$0xff]  ;;  %v1984_v43 = vpack.c.bf16 %v163_v40, %v155_v37  ;;  %v154_v44 = vld [vmem:[#allocation2 + $0x190] sm:$0xff]  ;;  %v169_v46 = vld [vmem:[#allocation2 + $0x208] sm:$0xff] }
  0x7a   :  { %1981 = vmatprep.subr.bf16.mxu1 %v1980_v30  ;;  %v162_v45 = vld [vmem:[#allocation2 + $0x1d0] sm:$0xff]  ;;  %v177_v47 = vld [vmem:[#allocation2 + $0x248] sm:$0xff]  ;;  %v171_v48 = vld [vmem:[#allocation2 + $0x218] sm:$0xff]  ;;  %v1886_v50 = vpack.c.bf16 %v160_v42, %v152_v41 }
  0x7b   :  { %v179_v49 = vld [vmem:[#allocation2 + $0x258] sm:$0xff]  ;;  %v1986_v51 = vpack.c.bf16 %v162_v45, %v154_v44  ;;  %v1888_v52 = vpack.c.bf16 %v177_v47, %v169_v46  ;;  %v168_v53 = vld [vmem:[#allocation2 + $0x200] sm:$0xff]  ;;  %v170_v55 = vld [vmem:[#allocation2 + $0x210] sm:$0xff]  ;;  %v506_v46 = vlaneseq  ;;  %v2630_v47 = vmov 1983009808  }
  0x7c   :  { %1883 = vmatpush1.bf16.msra.mxu0 %v1882_v34  ;;  %v176_v54 = vld [vmem:[#allocation2 + $0x240] sm:$0xff]  ;;  %v1988_v56 = vpack.c.bf16 %v179_v49, %v171_v48  ;;  %v178_v57 = vld [vmem:[#allocation2 + $0x250] sm:$0xff]  ;;  %v185_v58 = vld [vmem:[#allocation2 + $0x288] sm:$0xff]  ;;  %v549_v48 = vunpack.c.l.s4 %v2630_v47 }
  0x7d   :  { %1983 = vmatpush1.bf16.msra.mxu1 %v1982_v38  ;;  %1885 = vmatprep.subr.bf16.mxu0 %v1884_v39  ;;  %v193_v59 = vld [vmem:[#allocation2 + $0x2c8] sm:$0xff]  ;;  %v187_v60 = vld [vmem:[#allocation2 + $0x298] sm:$0xff]  ;;  %v1890_v62 = vpack.c.bf16 %v176_v54, %v168_v53  ;;  %v1990_v63 = vpack.c.bf16 %v178_v57, %v170_v55  ;;  %v184_v1 = vld [vmem:[#allocation2 + $0x280] sm:$0xff] }
  0x7e   :  { %1985 = vmatprep.subr.bf16.mxu1 %v1984_v43  ;;  %v195_v61 = vld [vmem:[#allocation2 + $0x2d8] sm:$0xff]  ;;  %v1892_v0 = vpack.c.bf16 %v193_v59, %v185_v58  ;;  %v192_v2 = vld [vmem:[#allocation2 + $0x2c0] sm:$0xff]  ;;  %v186_v3 = vld [vmem:[#allocation2 + $0x290] sm:$0xff] }
  0x7f   :  { %v1992_v4 = vpack.c.bf16 %v195_v61, %v187_v60  ;;  %v194_v5 = vld [vmem:[#allocation2 + $0x2d0] sm:$0xff]  ;;  %v201_v6 = vld [vmem:[#allocation2 + $0x308] sm:$0xff]  ;;  %v203_v8 = vld [vmem:[#allocation2 + $0x318] sm:$0xff]  ;;  %v1894_v10 = vpack.c.bf16 %v192_v2, %v184_v1  ;;  %v2747_v61 = vshrl.u32 %v506_v46, 7 }
  0x80   :  { %1887 = vmatpush1.bf16.msra.mxu0 %v1886_v50  ;;  %v209_v7 = vld [vmem:[#allocation2 + $0x348] sm:$0xff]  ;;  %v211_v9 = vld [vmem:[#allocation2 + $0x358] sm:$0xff]  ;;  %v1994_v11 = vpack.c.bf16 %v194_v5, %v186_v3  ;;  %v200_v13 = vld [vmem:[#allocation2 + $0x300] sm:$0xff] }
  0x81   :  { %1987 = vmatpush1.bf16.msra.mxu1 %v1986_v51  ;;  %1889 = vmatprep.subr.bf16.mxu0 %v1888_v52  ;;  %v1896_v12 = vpack.c.bf16 %v209_v7, %v201_v6  ;;  %v208_v14 = vld [vmem:[#allocation2 + $0x340] sm:$0xff]  ;;  %v202_v15 = vld [vmem:[#allocation2 + $0x310] sm:$0xff]  ;;  %v1996_v16 = vpack.c.bf16 %v211_v9, %v203_v8  ;;  %v217_v18 = vld [vmem:[#allocation2 + $0x388] sm:$0xff] }
  0x82   :  { %1989 = vmatprep.subr.bf16.mxu1 %v1988_v56  ;;  %v210_v17 = vld [vmem:[#allocation2 + $0x350] sm:$0xff]  ;;  %v225_v19 = vld [vmem:[#allocation2 + $0x3c8] sm:$0xff]  ;;  %v219_v20 = vld [vmem:[#allocation2 + $0x398] sm:$0xff]  ;;  %v1898_v22 = vpack.c.bf16 %v208_v14, %v200_v13 }
  0x83   :  { %v227_v21 = vld [vmem:[#allocation2 + $0x3d8] sm:$0xff]  ;;  %v1998_v23 = vpack.c.bf16 %v210_v17, %v202_v15  ;;  %v1900_v24 = vpack.c.bf16 %v225_v19, %v217_v18  ;;  %v216_v25 = vld [vmem:[#allocation2 + $0x380] sm:$0xff]  ;;  %v218_v27 = vld [vmem:[#allocation2 + $0x390] sm:$0xff] }
  0x84   :  { %1891 = vmatpush1.bf16.msra.mxu0 %v1890_v62  ;;  %v224_v26 = vld [vmem:[#allocation2 + $0x3c0] sm:$0xff]  ;;  %v2000_v28 = vpack.c.bf16 %v227_v21, %v219_v20  ;;  %v226_v29 = vld [vmem:[#allocation2 + $0x3d0] sm:$0xff]  ;;  %v233_v30 = vld [vmem:[#allocation2 + $0x408] sm:$0xff]  ;;  %v550_v62 = vunpack.c.0.s8 %v549_v48 }
  0x85   :  { %1991 = vmatpush1.bf16.msra.mxu1 %v1990_v63  ;;  %1893 = vmatprep.subr.bf16.mxu0 %v1892_v0  ;;  %v241_v31 = vld [vmem:[#allocation2 + $0x448] sm:$0xff]  ;;  %v235_v32 = vld [vmem:[#allocation2 + $0x418] sm:$0xff]  ;;  %v1902_v34 = vpack.c.bf16 %v224_v26, %v216_v25  ;;  %v2002_v35 = vpack.c.bf16 %v226_v29, %v218_v27  ;;  %v232_v37 = vld [vmem:[#allocation2 + $0x400] sm:$0xff] }
  0x86   :  { %1993 = vmatprep.subr.bf16.mxu1 %v1992_v4  ;;  %v243_v33 = vld [vmem:[#allocation2 + $0x458] sm:$0xff]  ;;  %v1904_v36 = vpack.c.bf16 %v241_v31, %v233_v30  ;;  %v240_v38 = vld [vmem:[#allocation2 + $0x440] sm:$0xff]  ;;  %v234_v39 = vld [vmem:[#allocation2 + $0x410] sm:$0xff] }
  0x87   :  { %v2004_v40 = vpack.c.bf16 %v243_v33, %v235_v32  ;;  %v242_v41 = vld [vmem:[#allocation2 + $0x450] sm:$0xff]  ;;  %v249_v42 = vld [vmem:[#allocation2 + $0x488] sm:$0xff]  ;;  %v251_v44 = vld [vmem:[#allocation2 + $0x498] sm:$0xff]  ;;  %v1906_v49 = vpack.c.bf16 %v240_v38, %v232_v37 }
  0x88   :  { %1895 = vmatpush1.bf16.msra.mxu0 %v1894_v10  ;;  %v257_v43 = vld [vmem:[#allocation2 + $0x4c8] sm:$0xff]  ;;  %v259_v45 = vld [vmem:[#allocation2 + $0x4d8] sm:$0xff]  ;;  %v2006_v50 = vpack.c.bf16 %v242_v41, %v234_v39  ;;  %v248_v52 = vld [vmem:[#allocation2 + $0x480] sm:$0xff] }
  0x89   :  { %1995 = vmatpush1.bf16.msra.mxu1 %v1994_v11  ;;  %1897 = vmatprep.subr.bf16.mxu0 %v1896_v12  ;;  %v1908_v51 = vpack.c.bf16 %v257_v43, %v249_v42  ;;  %v256_v53 = vld [vmem:[#allocation2 + $0x4c0] sm:$0xff]  ;;  %v250_v54 = vld [vmem:[#allocation2 + $0x490] sm:$0xff]  ;;  %v2008_v55 = vpack.c.bf16 %v259_v45, %v251_v44  ;;  %v265_v57 = vld [vmem:[#allocation2 + $0x508] sm:$0xff]  ;;  %v2750_v11 = vsub.s32 %v550_v62, %v2747_v61 }
  0x8a   :  { %1997 = vmatprep.subr.bf16.mxu1 %v1996_v16  ;;  %v258_v56 = vld [vmem:[#allocation2 + $0x4d0] sm:$0xff]  ;;  %v273_v58 = vld [vmem:[#allocation2 + $0x548] sm:$0xff]  ;;  %v267_v59 = vld [vmem:[#allocation2 + $0x518] sm:$0xff]  ;;  %v1910_v63 = vpack.c.bf16 %v256_v53, %v248_v52 }
  0x8b   :  { %v275_v60 = vld [vmem:[#allocation2 + $0x558] sm:$0xff]  ;;  %v2010_v0 = vpack.c.bf16 %v258_v56, %v250_v54  ;;  %v1912_v1 = vpack.c.bf16 %v273_v58, %v265_v57  ;;  %v264_v2 = vld [vmem:[#allocation2 + $0x500] sm:$0xff]  ;;  %v266_v4 = vld [vmem:[#allocation2 + $0x510] sm:$0xff] }
  0x8c   :  { %1899 = vmatpush1.bf16.msra.mxu0 %v1898_v22  ;;  %v272_v3 = vld [vmem:[#allocation2 + $0x540] sm:$0xff]  ;;  %v2012_v5 = vpack.c.bf16 %v275_v60, %v267_v59  ;;  %v274_v6 = vld [vmem:[#allocation2 + $0x550] sm:$0xff]  ;;  %v281_v7 = vld [vmem:[#allocation2 + $0x588] sm:$0xff] }
  0x8d   :  { %1999 = vmatpush1.bf16.msra.mxu1 %v1998_v23  ;;  %1901 = vmatprep.subr.bf16.mxu0 %v1900_v24  ;;  %v289_v8 = vld [vmem:[#allocation2 + $0x5c8] sm:$0xff]  ;;  %v283_v9 = vld [vmem:[#allocation2 + $0x598] sm:$0xff]  ;;  %v1914_v12 = vpack.c.bf16 %v272_v3, %v264_v2  ;;  %v280_v13 = vld [vmem:[#allocation2 + $0x580] sm:$0xff]  ;;  %v2014_v14 = vpack.c.bf16 %v274_v6, %v266_v4 }
  0x8e   :  { %2001 = vmatprep.subr.bf16.mxu1 %v2000_v28  ;;  %v291_v10 = vld [vmem:[#allocation2 + $0x5d8] sm:$0xff]  ;;  %v1916_v15 = vpack.c.bf16 %v289_v8, %v281_v7  ;;  %v288_v16 = vld [vmem:[#allocation2 + $0x5c0] sm:$0xff]  ;;  %v282_v17 = vld [vmem:[#allocation2 + $0x590] sm:$0xff] }
  0x8f   :  { %v290_v18 = vld [vmem:[#allocation2 + $0x5d0] sm:$0xff]  ;;  %v2016_v19 = vpack.c.bf16 %v291_v10, %v283_v9  ;;  %v297_v20 = vld [vmem:[#allocation2 + $0x608] sm:$0xff]  ;;  %v2755_v22 = vld [vmem:[%s2824_s0] sm:$0xff]  ;;  %v1918_v26 = vpack.c.bf16 %v288_v16, %v280_v13  ;;  %s2634_s0 = smov [#allocation13]  }
  0x90   :  { %1903 = vmatpush1.bf16.msra.mxu0 %v1902_v34  ;;  %v305_v21 = vld [vmem:[#allocation2 + $0x648] sm:$0xff]  ;;  %v299_v23 = vld [vmem:[#allocation2 + $0x618] sm:$0xff]  ;;  %v2759_v25 = vrot.slane %v2755_v22, %v2750_v11  ;;  %v2018_v27 = vpack.c.bf16 %v290_v18, %v282_v17  ;;  %v296_v29 = vld [vmem:[#allocation2 + $0x600] sm:$0xff]  ;;  %v547_v10 = vcombine.high %v2755_v22, %v2755_v22  ;;  %s1662_s25 = sshll.u32 %s2634_s0, 4  ;;  %s1663_s25 = int_to_ptr.vmem [resolvable:$true] %s1662_s25 }
  0x91   :  { %2003 = vmatpush1.bf16.msra.mxu1 %v2002_v35  ;;  %1905 = vmatprep.subr.bf16.mxu0 %v1904_v36  ;;  %v307_v24 = vld [vmem:[#allocation2 + $0x658] sm:$0xff]  ;;  %v1920_v28 = vpack.c.bf16 %v305_v21, %v297_v20  ;;  %v304_v30 = vld [vmem:[#allocation2 + $0x640] sm:$0xff]  ;;  %v298_v31 = vld [vmem:[#allocation2 + $0x610] sm:$0xff]  ;;  %s2588_s26 = scalar_lea.vmem %s1663_s25, 32  ;;  %p2593_p7 = scmp.lt.s32.totalorder %s1663_s25, %s1663_s25 }
  0x92   :  { %2005 = vmatprep.subr.bf16.mxu1 %v2004_v40  ;;  %v2763_v32 = vcombine.high %v2759_v25, %v2759_v25  ;;  %v2020_v33 = vpack.c.bf16 %v307_v24, %v299_v23  ;;  %v306_v34 = vld [vmem:[#allocation2 + $0x650] sm:$0xff]  ;;  %v313_v35 = vld [vmem:[#allocation2 + $0x688] sm:$0xff]  ;;  %v315_v37 = vld [vmem:[#allocation2 + $0x698] sm:$0xff]  ;;  %v1922_v39 = vpack.c.bf16 %v304_v30, %v296_v29  ;;  %p2589_p6 = scmp.ne.s32.totalorder %s1663_s25, %s2588_s26  ;;  %p2594_p8 = scmp.lt.s32.totalorder %s2588_s26, %s2588_s26 }
  0x93   :  { %v321_v36 = vld [vmem:[#allocation2 + $0x6c8] sm:$0xff]  ;;  %v323_v38 = vld [vmem:[#allocation2 + $0x6d8] sm:$0xff]  ;;  %v2022_v40 = vpack.c.bf16 %v306_v34, %v298_v31  ;;  %v312_v42 = vld [vmem:[#allocation2 + $0x680] sm:$0xff] }
  0x94   :  { %1907 = vmatpush1.bf16.msra.mxu0 %v1906_v49  ;;  %634 = vmatprep.mubr.f32.mxu0 %v2763_v32  ;;  %v1924_v41 = vpack.c.bf16 %v321_v36, %v313_v35  ;;  %v320_v43 = vld [vmem:[#allocation2 + $0x6c0] sm:$0xff]  ;;  %v314_v44 = vld [vmem:[#allocation2 + $0x690] sm:$0xff]  ;;  %v2024_v45 = vpack.c.bf16 %v323_v38, %v315_v37  ;;  %v329_v47 = vld [vmem:[#allocation2 + $0x708] sm:$0xff]  ;;  %p2595_p9 = por %p2594_p8, %p2593_p7 }
  0x95   :  { %2007 = vmatpush1.bf16.msra.mxu1 %v2006_v50  ;;  %1909 = vmatprep.subr.bf16.mxu0 %v1908_v51  ;;  %v322_v46 = vld [vmem:[#allocation2 + $0x6d0] sm:$0xff]  ;;  %v337_v48 = vld [vmem:[#allocation2 + $0x748] sm:$0xff]  ;;  %v331_v49 = vld [vmem:[#allocation2 + $0x718] sm:$0xff]  ;;  %v1926_v51 = vpack.c.bf16 %v320_v43, %v312_v42 }
  0x96   :  { %2009 = vmatprep.subr.bf16.mxu1 %v2008_v55  ;;  %776 = vmatprep.mubr.f32.mxu1 %v2763_v32  ;;  %v339_v50 = vld [vmem:[#allocation2 + $0x758] sm:$0xff]  ;;  %v2026_v52 = vpack.c.bf16 %v322_v46, %v314_v44  ;;  %v1928_v53 = vpack.c.bf16 %v337_v48, %v329_v47  ;;  %v328_v54 = vld [vmem:[#allocation2 + $0x700] sm:$0xff]  ;;  %v330_v56 = vld [vmem:[#allocation2 + $0x710] sm:$0xff]  ;;  %p2596_p10 = pnand %p2595_p9, %p2589_p6 }
  0x97   :  { %v336_v55 = vld [vmem:[#allocation2 + $0x740] sm:$0xff]  ;;  %v2028_v57 = vpack.c.bf16 %v339_v50, %v331_v49  ;;  %v338_v58 = vld [vmem:[#allocation2 + $0x750] sm:$0xff]  ;;  %v345_v59 = vld [vmem:[#allocation2 + $0x788] sm:$0xff] }
  0x98   :  { %1911 = vmatpush1.bf16.msra.mxu0 %v1910_v63  ;;  %v353_v60 = vld [vmem:[#allocation2 + $0x7c8] sm:$0xff]  ;;  %v347_v62 = vld [vmem:[#allocation2 + $0x798] sm:$0xff]  ;;  %v344_v3 = vld [vmem:[#allocation2 + $0x780] sm:$0xff] }
  0x99   :  { %2011 = vmatpush1.bf16.msra.mxu1 %v2010_v0  ;;  %1913 = vmatprep.subr.bf16.mxu0 %v1912_v1  ;;  %v355_v63 = vld [vmem:[#allocation2 + $0x7d8] sm:$0xff]  ;;  %v1930_v0 = vpack.c.bf16 %v336_v55, %v328_v54  ;;  %v2030_v1 = vpack.c.bf16 %v338_v58, %v330_v56  ;;  %v1932_v2 = vpack.c.bf16 %v353_v60, %v345_v59  ;;  %v352_v4 = vld [vmem:[#allocation2 + $0x7c0] sm:$0xff]  ;;  %v354_v7 = vld [vmem:[#allocation2 + $0x7d0] sm:$0xff] }
  0x9a   :  { %2013 = vmatprep.subr.bf16.mxu1 %v2012_v5  ;;  %v346_v5 = vld [vmem:[#allocation2 + $0x790] sm:$0xff]  ;;  %v2032_v6 = vpack.c.bf16 %v355_v63, %v347_v62  ;;  %v361_v8 = vld [vmem:[#allocation2 + $0x808] sm:$0xff]  ;;  %v371_v13 = vld [vmem:[#allocation2 + $0x858] sm:$0xff] }
  0x9b   :  { %v369_v9 = vld [vmem:[#allocation2 + $0x848] sm:$0xff]  ;;  %v360_v17 = vld [vmem:[#allocation2 + $0x800] sm:$0xff]  ;;  %v370_v21 = vld [vmem:[#allocation2 + $0x850] sm:$0xff] }
  0x9c   :  { %1915 = vmatpush1.bf16.msra.mxu0 %v1914_v12  ;;  %v363_v12 = vld [vmem:[#allocation2 + $0x818] sm:$0xff]  ;;  %v1936_v16 = vpack.c.bf16 %v369_v9, %v361_v8  ;;  %v368_v18 = vld [vmem:[#allocation2 + $0x840] sm:$0xff]  ;;  %v377_v23 = vld [vmem:[#allocation2 + $0x888] sm:$0xff] }
  0x9d   :  { %2015 = vmatpush1.bf16.msra.mxu1 %v2014_v14  ;;  %1917 = vmatprep.subr.bf16.mxu0 %v1916_v15  ;;  %v1934_v14 = vpack.c.bf16 %v352_v4, %v344_v3  ;;  %v2034_v15 = vpack.c.bf16 %v354_v7, %v346_v5  ;;  %v2036_v20 = vpack.c.bf16 %v371_v13, %v363_v12  ;;  %v385_v24 = vld [vmem:[#allocation2 + $0x8c8] sm:$0xff]  ;;  %v379_v22 = vld [vmem:[#allocation2 + $0x898] sm:$0xff]  ;;  %v376_v31 = vld [vmem:[#allocation2 + $0x880] sm:$0xff] }
  0x9e   :  { %2017 = vmatprep.subr.bf16.mxu1 %v2016_v19  ;;  %v362_v19 = vld [vmem:[#allocation2 + $0x810] sm:$0xff]  ;;  %v1940_v30 = vpack.c.bf16 %v385_v24, %v377_v23  ;;  %v393_v37 = vld [vmem:[#allocation2 + $0x908] sm:$0xff]  ;;  %v392_v44 = vld [vmem:[#allocation2 + $0x900] sm:$0xff] }
  0x9f   :  { %v2038_v29 = vpack.c.bf16 %v370_v21, %v362_v19  ;;  %v378_v34 = vld [vmem:[#allocation2 + $0x890] sm:$0xff]  ;;  %v401_v38 = vld [vmem:[#allocation2 + $0x948] sm:$0xff]  ;;  %v408_v56 = vld [vmem:[#allocation2 + $0x980] sm:$0xff] }
  0xa0   :  { %1919 = vmatpush1.bf16.msra.mxu0 %v1918_v26  ;;  %v2770_v26 = vrot.slane %v547_v10, %v2750_v11  ;;  %v386_v36 = vld [vmem:[#allocation2 + $0x8d0] sm:$0xff]  ;;  %v1944_v43 = vpack.c.bf16 %v401_v38, %v393_v37  ;;  %v409_v49 = vld [vmem:[#allocation2 + $0x988] sm:$0xff]  ;;  %v424_v5 = vld [vmem:[#allocation2 + $0xa00] sm:$0xff] }
  0xa1   :  { %2019 = vmatpush1.bf16.msra.mxu1 %v2018_v27  ;;  %1921 = vmatprep.subr.bf16.mxu0 %v1920_v28  ;;  %v387_v27 = vld [vmem:[#allocation2 + $0x8d8] sm:$0xff]  ;;  %v1938_v28 = vpack.c.bf16 %v368_v18, %v360_v17  ;;  %v2042_v42 = vpack.c.bf16 %v386_v36, %v378_v34  ;;  %v394_v46 = vld [vmem:[#allocation2 + $0x910] sm:$0xff]  ;;  %v417_v50 = vld [vmem:[#allocation2 + $0x9c8] sm:$0xff] }
  0xa2   :  { %2021 = vmatprep.subr.bf16.mxu1 %v2020_v33  ;;  %v384_v33 = vld [vmem:[#allocation2 + $0x8c0] sm:$0xff]  ;;  %v2040_v35 = vpack.c.bf16 %v387_v27, %v379_v22  ;;  %v2774_v11 = vcombine.high %v2770_v26, %v2770_v26  ;;  %v402_v48 = vld [vmem:[#allocation2 + $0x950] sm:$0xff]  ;;  %v1948_v55 = vpack.c.bf16 %v417_v50, %v409_v49  ;;  %v425_v62 = vld [vmem:[#allocation2 + $0xa08] sm:$0xff] }
  0xa3   :  { %v2046_v54 = vpack.c.bf16 %v402_v48, %v394_v46  ;;  %v410_v58 = vld [vmem:[#allocation2 + $0x990] sm:$0xff]  ;;  %v433_v63 = vld [vmem:[#allocation2 + $0xa48] sm:$0xff]  ;;  %v443_v13 = vld [vmem:[#allocation2 + $0xa98] sm:$0xff] }
  0xa4   :  { %1923 = vmatpush1.bf16.msra.mxu0 %v1922_v39  ;;  %v395_v39 = vld [vmem:[#allocation2 + $0x918] sm:$0xff]  ;;  %v418_v60 = vld [vmem:[#allocation2 + $0x9d0] sm:$0xff]  ;;  %v1952_v4 = vpack.c.bf16 %v433_v63, %v425_v62  ;;  %v441_v10 = vld [vmem:[#allocation2 + $0xa88] sm:$0xff] }
  0xa5   :  { %2023 = vmatpush1.bf16.msra.mxu1 %v2022_v40  ;;  %1925 = vmatprep.subr.bf16.mxu0 %v1924_v41  ;;  %v403_v40 = vld [vmem:[#allocation2 + $0x958] sm:$0xff]  ;;  %v1942_v41 = vpack.c.bf16 %v384_v33, %v376_v31  ;;  %v2050_v3 = vpack.c.bf16 %v418_v60, %v410_v58  ;;  %v426_v7 = vld [vmem:[#allocation2 + $0xa10] sm:$0xff]  ;;  %v449_v12 = vld [vmem:[#allocation2 + $0xac8] sm:$0xff] }
  0xa6   :  { %2025 = vmatprep.subr.bf16.mxu1 %v2024_v45  ;;  %v400_v45 = vld [vmem:[#allocation2 + $0x940] sm:$0xff]  ;;  %v2044_v47 = vpack.c.bf16 %v403_v40, %v395_v39  ;;  %v434_v9 = vld [vmem:[#allocation2 + $0xa50] sm:$0xff]  ;;  %v1956_v17 = vpack.c.bf16 %v449_v12, %v441_v10  ;;  %v457_v24 = vld [vmem:[#allocation2 + $0xb08] sm:$0xff] }
  0xa7   :  { %v440_v18 = vld [vmem:[#allocation2 + $0xa80] sm:$0xff]  ;;  %v450_v23 = vld [vmem:[#allocation2 + $0xad0] sm:$0xff]  ;;  %v465_v22 = vld [vmem:[#allocation2 + $0xb48] sm:$0xff] }
  0xa8   :  { %1927 = vmatpush1.bf16.msra.mxu0 %v1926_v51  ;;  %v411_v51 = vld [vmem:[#allocation2 + $0x998] sm:$0xff]  ;;  %v448_v19 = vld [vmem:[#allocation2 + $0xac0] sm:$0xff]  ;;  %v1960_v31 = vpack.c.bf16 %v465_v22, %v457_v24  ;;  %v466_v37 = vld [vmem:[#allocation2 + $0xb50] sm:$0xff] }
  0xa9   :  { %2027 = vmatpush1.bf16.msra.mxu1 %v2026_v52  ;;  %1929 = vmatprep.subr.bf16.mxu0 %v1928_v53  ;;  %v419_v52 = vld [vmem:[#allocation2 + $0x9d8] sm:$0xff]  ;;  %v1946_v53 = vpack.c.bf16 %v400_v45, %v392_v44  ;;  %v456_v33 = vld [vmem:[#allocation2 + $0xb00] sm:$0xff]  ;;  %v473_v38 = vld [vmem:[#allocation2 + $0xb88] sm:$0xff] }
  0xaa   :  { %2029 = vmatprep.subr.bf16.mxu1 %v2028_v57  ;;  %v416_v57 = vld [vmem:[#allocation2 + $0x9c0] sm:$0xff]  ;;  %v2048_v59 = vpack.c.bf16 %v419_v52, %v411_v51  ;;  %v459_v27 = vld [vmem:[#allocation2 + $0xb18] sm:$0xff]  ;;  %v481_v39 = vld [vmem:[#allocation2 + $0xbc8] sm:$0xff] }
  0xab   :  { %v464_v34 = vld [vmem:[#allocation2 + $0xb40] sm:$0xff]  ;;  %v475_v40 = vld [vmem:[#allocation2 + $0xb98] sm:$0xff]  ;;  %v1964_v44 = vpack.c.bf16 %v481_v39, %v473_v38  ;;  %v482_v49 = vld [vmem:[#allocation2 + $0xbd0] sm:$0xff] }
  0xac   :  { %1931 = vmatpush1.bf16.msra.mxu0 %v1930_v0  ;;  %v427_v0 = vld [vmem:[#allocation2 + $0xa18] sm:$0xff]  ;;  %v472_v45 = vld [vmem:[#allocation2 + $0xb80] sm:$0xff]  ;;  %v489_v50 = vld [vmem:[#allocation2 + $0xc08] sm:$0xff] }
  0xad   :  { %2031 = vmatpush1.bf16.msra.mxu1 %v2030_v1  ;;  %1933 = vmatprep.subr.bf16.mxu0 %v1932_v2  ;;  %v435_v1 = vld [vmem:[#allocation2 + $0xa58] sm:$0xff]  ;;  %v1950_v2 = vpack.c.bf16 %v416_v57, %v408_v56  ;;  %v480_v46 = vld [vmem:[#allocation2 + $0xbc0] sm:$0xff]  ;;  %v497_v51 = vld [vmem:[#allocation2 + $0xc48] sm:$0xff] }
  0xae   :  { %2033 = vmatprep.subr.bf16.mxu1 %v2032_v6  ;;  %v432_v6 = vld [vmem:[#allocation2 + $0xa40] sm:$0xff]  ;;  %v2052_v8 = vpack.c.bf16 %v435_v1, %v427_v0  ;;  %v491_v52 = vld [vmem:[#allocation2 + $0xc18] sm:$0xff]  ;;  %v1968_v56 = vpack.c.bf16 %v497_v51, %v489_v50  ;;  %v498_v62 = vld [vmem:[#allocation2 + $0xc50] sm:$0xff] }
  0xaf   :  { %v488_v57 = vld [vmem:[#allocation2 + $0xc00] sm:$0xff]  ;;  %v109_v63 = vld [vmem:[#allocation2 + $0x28] sm:$0xff]  ;;  %v111_v1 = vld [vmem:[#allocation2 + $0x38] sm:$0xff] }
  0xb0   :  { %1935 = vmatpush1.bf16.msra.mxu0 %v1934_v14  ;;  %v451_v14 = vld [vmem:[#allocation2 + $0xad8] sm:$0xff]  ;;  %v496_v58 = vld [vmem:[#allocation2 + $0xc40] sm:$0xff]  ;;  %v117_v0 = vld [vmem:[#allocation2 + $0x68] sm:$0xff] }
  0xb1   :  { %2035 = vmatpush1.bf16.msra.mxu1 %v2034_v15  ;;  %1937 = vmatprep.subr.bf16.mxu0 %v1936_v16  ;;  %v1954_v15 = vpack.c.bf16 %v432_v6, %v424_v5  ;;  %v2054_v16 = vpack.c.bf16 %v434_v9, %v426_v7  ;;  %v2056_v21 = vpack.c.bf16 %v451_v14, %v443_v13  ;;  %v108_v6 = vld [vmem:[#allocation2 + $0x20] sm:$0xff]  ;;  %v118_v10 = vld [vmem:[#allocation2 + $0x70] sm:$0xff]  ;;  %v125_v12 = vld [vmem:[#allocation2 + $0xa8] sm:$0xff] }
  0xb2   :  { %2037 = vmatprep.subr.bf16.mxu1 %v2036_v20  ;;  %v442_v20 = vld [vmem:[#allocation2 + $0xa90] sm:$0xff]  ;;  %v2072_v5 = vpack.c.bf16 %v117_v0, %v109_v63  ;;  %v116_v7 = vld [vmem:[#allocation2 + $0x60] sm:$0xff]  ;;  %v133_v13 = vld [vmem:[#allocation2 + $0xe8] sm:$0xff] }
  0xb3   :  { %635 = vmatmul.mubr.f32.vlgmr.msra.gmra.mrb[0].mxu0 %v2759_v25  ;;  %v127_v14 = vld [vmem:[#allocation2 + $0xb8] sm:$0xff]  ;;  %v134_v24 = vld [vmem:[#allocation2 + $0xf0] sm:$0xff]  ;;  %v141_v22 = vld [vmem:[#allocation2 + $0x128] sm:$0xff] }
  0xb4   :  { %1939 = vmatpush1.bf16.msra.mxu0 %v1938_v28  ;;  %777 = vmatmul.mubr.f32.vlgmr.msra.gmra.mrb[0].mxu1 %v2759_v25  ;;  %v467_v28 = vld [vmem:[#allocation2 + $0xb58] sm:$0xff]  ;;  %v150_v38 = vld [vmem:[#allocation2 + $0x170] sm:$0xff]  ;;  %v157_v39 = vld [vmem:[#allocation2 + $0x1a8] sm:$0xff] }
  0xb5   :  { %2039 = vmatpush1.bf16.msra.mxu1 %v2038_v29  ;;  %1941 = vmatprep.subr.bf16.mxu0 %v1940_v30  ;;  %v1958_v29 = vpack.c.bf16 %v448_v19, %v440_v18  ;;  %v2058_v30 = vpack.c.bf16 %v450_v23, %v442_v20  ;;  %v2060_v36 = vpack.c.bf16 %v467_v28, %v459_v27  ;;  %v124_v19 = vld [vmem:[#allocation2 + $0xa0] sm:$0xff]  ;;  %v149_v27 = vld [vmem:[#allocation2 + $0x168] sm:$0xff]  ;;  %v143_v28 = vld [vmem:[#allocation2 + $0x138] sm:$0xff] }
  0xb6   :  { %2041 = vmatprep.subr.bf16.mxu1 %v2040_v35  ;;  %1674 = vmatprep.mubr.msk.f32.mxu0 %vm567_vm0, %v2774_v11  ;;  %v458_v35 = vld [vmem:[#allocation2 + $0xb10] sm:$0xff]  ;;  %v2076_v18 = vpack.c.bf16 %v133_v13, %v125_v12  ;;  %v132_v20 = vld [vmem:[#allocation2 + $0xe0] sm:$0xff]  ;;  %v173_v51 = vld [vmem:[#allocation2 + $0x228] sm:$0xff] }
  0xb7   :  { %1675 = vmatprep.mubr.msk.f32.mxu1 %vm567_vm0, %v2774_v11  ;;  %v166_v50 = vld [vmem:[#allocation2 + $0x1f0] sm:$0xff]  ;;  %v189_v63 = vld [vmem:[#allocation2 + $0x2a8] sm:$0xff] }
  0xb8   :  { %1943 = vmatpush1.bf16.msra.mxu0 %v1942_v41  ;;  %v483_v41 = vld [vmem:[#allocation2 + $0xbd8] sm:$0xff]  ;;  %v197_v0 = vld [vmem:[#allocation2 + $0x2e8] sm:$0xff] }
  0xb9   :  { %2043 = vmatpush1.bf16.msra.mxu1 %v2042_v42  ;;  %1945 = vmatprep.subr.bf16.mxu0 %v1944_v43  ;;  %v1962_v42 = vpack.c.bf16 %v464_v34, %v456_v33  ;;  %v2062_v43 = vpack.c.bf16 %v466_v37, %v458_v35  ;;  %v2064_v48 = vpack.c.bf16 %v483_v41, %v475_v40  ;;  %v140_v34 = vld [vmem:[#allocation2 + $0x120] sm:$0xff]  ;;  %v165_v40 = vld [vmem:[#allocation2 + $0x1e8] sm:$0xff]  ;;  %v159_v41 = vld [vmem:[#allocation2 + $0x1b8] sm:$0xff] }
  0xba   :  { %2045 = vmatprep.subr.bf16.mxu1 %v2044_v47  ;;  %v474_v47 = vld [vmem:[#allocation2 + $0xb90] sm:$0xff]  ;;  %v2080_v33 = vpack.c.bf16 %v149_v27, %v141_v22  ;;  %v148_v35 = vld [vmem:[#allocation2 + $0x160] sm:$0xff]  ;;  %v205_v12 = vld [vmem:[#allocation2 + $0x328] sm:$0xff] }
  0xbb   :  { %v213_v13 = vld [vmem:[#allocation2 + $0x368] sm:$0xff] }
  0xbc   :  { %1947 = vmatpush1.bf16.msra.mxu0 %v1946_v53  ;;  %v499_v53 = vld [vmem:[#allocation2 + $0xc58] sm:$0xff]  ;;  %v221_v22 = vld [vmem:[#allocation2 + $0x3a8] sm:$0xff] }
  0xbd   :  { %2047 = vmatpush1.bf16.msra.mxu1 %v2046_v54  ;;  %1949 = vmatprep.subr.bf16.mxu0 %v1948_v55  ;;  %v1966_v54 = vpack.c.bf16 %v480_v46, %v472_v45  ;;  %v2066_v55 = vpack.c.bf16 %v482_v49, %v474_v47  ;;  %v2068_v60 = vpack.c.bf16 %v499_v53, %v491_v52  ;;  %v156_v46 = vld [vmem:[#allocation2 + $0x1a0] sm:$0xff]  ;;  %v181_v52 = vld [vmem:[#allocation2 + $0x268] sm:$0xff]  ;;  %v175_v53 = vld [vmem:[#allocation2 + $0x238] sm:$0xff] }
  0xbe   :  { %2049 = vmatprep.subr.bf16.mxu1 %v2048_v59  ;;  %v490_v59 = vld [vmem:[#allocation2 + $0xc10] sm:$0xff]  ;;  %v2084_v45 = vpack.c.bf16 %v165_v40, %v157_v39  ;;  %v164_v47 = vld [vmem:[#allocation2 + $0x1e0] sm:$0xff]  ;;  %v229_v27 = vld [vmem:[#allocation2 + $0x3e8] sm:$0xff] }
  0xbf   :  { %v237_v39 = vld [vmem:[#allocation2 + $0x428] sm:$0xff] }
  0xc0   :  { %1951 = vmatpush1.bf16.msra.mxu0 %v1950_v2  ;;  %v119_v2 = vld [vmem:[#allocation2 + $0x78] sm:$0xff]  ;;  %v245_v40 = vld [vmem:[#allocation2 + $0x468] sm:$0xff] }
  0xc1   :  { %2051 = vmatpush1.bf16.msra.mxu1 %v2050_v3  ;;  %1953 = vmatprep.subr.bf16.mxu0 %v1952_v4  ;;  %v1970_v3 = vpack.c.bf16 %v496_v58, %v488_v57  ;;  %v2070_v4 = vpack.c.bf16 %v498_v62, %v490_v59  ;;  %v2172_v9 = vpack.c.bf16 %v119_v2, %v111_v1  ;;  %v172_v57 = vld [vmem:[#allocation2 + $0x220] sm:$0xff]  ;;  %v174_v59 = vld [vmem:[#allocation2 + $0x230] sm:$0xff]  ;;  %v191_v1 = vld [vmem:[#allocation2 + $0x2b8] sm:$0xff] }
  0xc2   :  { %2053 = vmatprep.subr.bf16.mxu1 %v2052_v8  ;;  %v110_v8 = vld [vmem:[#allocation2 + $0x30] sm:$0xff]  ;;  %v180_v58 = vld [vmem:[#allocation2 + $0x260] sm:$0xff]  ;;  %v199_v2 = vld [vmem:[#allocation2 + $0x2f8] sm:$0xff] }
  0xc3   :  { %v182_v62 = vld [vmem:[#allocation2 + $0x270] sm:$0xff] }
  0xc4   :  { %1955 = vmatpush1.bf16.msra.mxu0 %v1954_v15  ;;  %v135_v15 = vld [vmem:[#allocation2 + $0xf8] sm:$0xff] }
  0xc5   :  { %2055 = vmatpush1.bf16.msra.mxu1 %v2054_v16  ;;  %1957 = vmatprep.subr.bf16.mxu0 %v1956_v17  ;;  %v2074_v16 = vpack.c.bf16 %v116_v7, %v108_v6  ;;  %v2174_v17 = vpack.c.bf16 %v118_v10, %v110_v8  ;;  %v2176_v23 = vpack.c.bf16 %v135_v15, %v127_v14  ;;  %v188_v6 = vld [vmem:[#allocation2 + $0x2a0] sm:$0xff]  ;;  %v190_v8 = vld [vmem:[#allocation2 + $0x2b0] sm:$0xff]  ;;  %v207_v14 = vld [vmem:[#allocation2 + $0x338] sm:$0xff] }
  0xc6   :  { %2057 = vmatprep.subr.bf16.mxu1 %v2056_v21  ;;  %v126_v21 = vld [vmem:[#allocation2 + $0xb0] sm:$0xff]  ;;  %v196_v7 = vld [vmem:[#allocation2 + $0x2e0] sm:$0xff]  ;;  %v215_v15 = vld [vmem:[#allocation2 + $0x378] sm:$0xff] }
  0xc7   :  { %v198_v10 = vld [vmem:[#allocation2 + $0x2f0] sm:$0xff] }
  0xc8   :  { %1959 = vmatpush1.bf16.msra.mxu0 %v1958_v29  ;;  %v151_v29 = vld [vmem:[#allocation2 + $0x178] sm:$0xff] }
  0xc9   :  { %2059 = vmatpush1.bf16.msra.mxu1 %v2058_v30  ;;  %1961 = vmatprep.subr.bf16.mxu0 %v1960_v31  ;;  %v2078_v30 = vpack.c.bf16 %v132_v20, %v124_v19  ;;  %v2178_v31 = vpack.c.bf16 %v134_v24, %v126_v21  ;;  %v2180_v37 = vpack.c.bf16 %v151_v29, %v143_v28  ;;  %v204_v19 = vld [vmem:[#allocation2 + $0x320] sm:$0xff]  ;;  %v206_v21 = vld [vmem:[#allocation2 + $0x330] sm:$0xff]  ;;  %v223_v28 = vld [vmem:[#allocation2 + $0x3b8] sm:$0xff] }
  0xca   :  { %2061 = vmatprep.subr.bf16.mxu1 %v2060_v36  ;;  %v142_v36 = vld [vmem:[#allocation2 + $0x130] sm:$0xff]  ;;  %v212_v20 = vld [vmem:[#allocation2 + $0x360] sm:$0xff]  ;;  %v231_v29 = vld [vmem:[#allocation2 + $0x3f8] sm:$0xff] }
  0xcb   :  { %v214_v24 = vld [vmem:[#allocation2 + $0x370] sm:$0xff] }
  0xcc   :  { %1963 = vmatpush1.bf16.msra.mxu0 %v1962_v42  ;;  %v167_v42 = vld [vmem:[#allocation2 + $0x1f8] sm:$0xff] }
  0xcd   :  { %2063 = vmatpush1.bf16.msra.mxu1 %v2062_v43  ;;  %1965 = vmatprep.subr.bf16.mxu0 %v1964_v44  ;;  %v2082_v43 = vpack.c.bf16 %v148_v35, %v140_v34  ;;  %v2182_v44 = vpack.c.bf16 %v150_v38, %v142_v36  ;;  %v2184_v49 = vpack.c.bf16 %v167_v42, %v159_v41  ;;  %v220_v34 = vld [vmem:[#allocation2 + $0x3a0] sm:$0xff]  ;;  %v222_v36 = vld [vmem:[#allocation2 + $0x3b0] sm:$0xff]  ;;  %v239_v41 = vld [vmem:[#allocation2 + $0x438] sm:$0xff] }
  0xce   :  { %2065 = vmatprep.subr.bf16.mxu1 %v2064_v48  ;;  %v158_v48 = vld [vmem:[#allocation2 + $0x1b0] sm:$0xff]  ;;  %v228_v35 = vld [vmem:[#allocation2 + $0x3e0] sm:$0xff]  ;;  %v247_v42 = vld [vmem:[#allocation2 + $0x478] sm:$0xff] }
  0xcf   :  { %v230_v38 = vld [vmem:[#allocation2 + $0x3f0] sm:$0xff] }
  0xd0   :  { %1967 = vmatpush1.bf16.msra.mxu0 %v1966_v54  ;;  %v183_v54 = vld [vmem:[#allocation2 + $0x278] sm:$0xff] }
  0xd1   :  { %2067 = vmatpush1.bf16.msra.mxu1 %v2066_v55  ;;  %1969 = vmatprep.subr.bf16.mxu0 %v1968_v56  ;;  %v2086_v55 = vpack.c.bf16 %v164_v47, %v156_v46  ;;  %v2088_v56 = vpack.c.bf16 %v181_v52, %v173_v51  ;;  %v236_v46 = vld [vmem:[#allocation2 + $0x420] sm:$0xff]  ;;  %v253_v51 = vld [vmem:[#allocation2 + $0x4a8] sm:$0xff] }
  0xd2   :  { %2069 = vmatprep.subr.bf16.mxu1 %v2068_v60  ;;  %v2188_v60 = vpack.c.bf16 %v183_v54, %v175_v53  ;;  %v244_v47 = vld [vmem:[#allocation2 + $0x460] sm:$0xff]  ;;  %v261_v52 = vld [vmem:[#allocation2 + $0x4e8] sm:$0xff]  ;;  %v255_v53 = vld [vmem:[#allocation2 + $0x4b8] sm:$0xff] }
  0xd3   :  { %v263_v54 = vld [vmem:[#allocation2 + $0x4f8] sm:$0xff] }
  0xd4   :  { %1971 = vmatpush1.bf16.msra.mxu0 %v1970_v3  ;;  %v2090_v3 = vpack.c.bf16 %v180_v58, %v172_v57  ;;  %v252_v57 = vld [vmem:[#allocation2 + $0x4a0] sm:$0xff] }
  0xd5   :  { %2071 = vmatpush1.bf16.msra.mxu1 %v2070_v4  ;;  %2073 = vmatprep.subr.bf16.mxu0 %v2072_v5  ;;  %v2190_v4 = vpack.c.bf16 %v182_v62, %v174_v59  ;;  %v2092_v5 = vpack.c.bf16 %v197_v0, %v189_v63  ;;  %v260_v58 = vld [vmem:[#allocation2 + $0x4e0] sm:$0xff]  ;;  %v254_v59 = vld [vmem:[#allocation2 + $0x4b0] sm:$0xff]  ;;  %v269_v63 = vld [vmem:[#allocation2 + $0x528] sm:$0xff] }
  0xd6   :  { %2173 = vmatprep.subr.bf16.mxu1 %v2172_v9  ;;  %v2192_v9 = vpack.c.bf16 %v199_v2, %v191_v1  ;;  %v262_v62 = vld [vmem:[#allocation2 + $0x4f0] sm:$0xff]  ;;  %v277_v0 = vld [vmem:[#allocation2 + $0x568] sm:$0xff]  ;;  %v271_v1 = vld [vmem:[#allocation2 + $0x538] sm:$0xff] }
  0xd7   :  { %706 = vmatmul.mubr.f32.vlgmr.msra.gmra.mrb[0].mxu0 %v2770_v26  ;;  %v279_v2 = vld [vmem:[#allocation2 + $0x578] sm:$0xff] }
  0xd8   :  { %848 = vmatmul.mubr.f32.vlgmr.msra.gmra.mrb[0].mxu1 %v2770_v26  ;;  %2075 = vmatpush1.bf16.msra.mxu0 %v2074_v16  ;;  %v2094_v16 = vpack.c.bf16 %v196_v7, %v188_v6  ;;  %v268_v6 = vld [vmem:[#allocation2 + $0x520] sm:$0xff] }
  0xd9   :  { %2175 = vmatpush1.bf16.msra.mxu1 %v2174_v17  ;;  %2077 = vmatprep.subr.bf16.mxu0 %v2076_v18  ;;  %v2194_v17 = vpack.c.bf16 %v198_v10, %v190_v8  ;;  %v2096_v18 = vpack.c.bf16 %v213_v13, %v205_v12  ;;  %v276_v7 = vld [vmem:[#allocation2 + $0x560] sm:$0xff]  ;;  %v270_v8 = vld [vmem:[#allocation2 + $0x530] sm:$0xff]  ;;  %v285_v12 = vld [vmem:[#allocation2 + $0x5a8] sm:$0xff] }
  0xda   :  { %2177 = vmatprep.subr.bf16.mxu1 %v2176_v23  ;;  %918 = vmatprep.mubr.f32.mxu0 %v2763_v32  ;;  %v2196_v23 = vpack.c.bf16 %v215_v15, %v207_v14  ;;  %v278_v10 = vld [vmem:[#allocation2 + $0x570] sm:$0xff]  ;;  %v293_v13 = vld [vmem:[#allocation2 + $0x5e8] sm:$0xff]  ;;  %v287_v14 = vld [vmem:[#allocation2 + $0x5b8] sm:$0xff] }
  0xdb   :  { %1060 = vmatprep.mubr.f32.mxu1 %v2763_v32  ;;  %v2186_v32 = vpack.c.bf16 %v166_v50, %v158_v48  ;;  %v238_v48 = vld [vmem:[#allocation2 + $0x430] sm:$0xff]  ;;  %v295_v15 = vld [vmem:[#allocation2 + $0x5f8] sm:$0xff] }
  0xdc   :  { %2079 = vmatpush1.bf16.msra.mxu0 %v2078_v30  ;;  %v2098_v30 = vpack.c.bf16 %v212_v20, %v204_v19  ;;  %v246_v50 = vld [vmem:[#allocation2 + $0x470] sm:$0xff]  ;;  %v284_v19 = vld [vmem:[#allocation2 + $0x5a0] sm:$0xff] }
  0xdd   :  { %2179 = vmatpush1.bf16.msra.mxu1 %v2178_v31  ;;  %2081 = vmatprep.subr.bf16.mxu0 %v2080_v33  ;;  %v2198_v31 = vpack.c.bf16 %v214_v24, %v206_v21  ;;  %v2100_v33 = vpack.c.bf16 %v229_v27, %v221_v22  ;;  %v292_v20 = vld [vmem:[#allocation2 + $0x5e0] sm:$0xff]  ;;  %v286_v21 = vld [vmem:[#allocation2 + $0x5b0] sm:$0xff]  ;;  %v301_v22 = vld [vmem:[#allocation2 + $0x628] sm:$0xff] }
  0xde   :  { %2181 = vmatprep.subr.bf16.mxu1 %v2180_v37  ;;  %v2200_v37 = vpack.c.bf16 %v231_v29, %v223_v28  ;;  %v294_v24 = vld [vmem:[#allocation2 + $0x5f0] sm:$0xff]  ;;  %v309_v27 = vld [vmem:[#allocation2 + $0x668] sm:$0xff]  ;;  %v303_v28 = vld [vmem:[#allocation2 + $0x638] sm:$0xff] }
  0xdf   :  { %v311_v29 = vld [vmem:[#allocation2 + $0x678] sm:$0xff] }
  0xe0   :  { %2083 = vmatpush1.bf16.msra.mxu0 %v2082_v43  ;;  %v2102_v43 = vpack.c.bf16 %v228_v35, %v220_v34  ;;  %v300_v34 = vld [vmem:[#allocation2 + $0x620] sm:$0xff] }
  0xe1   :  { %2183 = vmatpush1.bf16.msra.mxu1 %v2182_v44  ;;  %2085 = vmatprep.subr.bf16.mxu0 %v2084_v45  ;;  %v2202_v44 = vpack.c.bf16 %v230_v38, %v222_v36  ;;  %v2104_v45 = vpack.c.bf16 %v245_v40, %v237_v39  ;;  %v308_v35 = vld [vmem:[#allocation2 + $0x660] sm:$0xff]  ;;  %v302_v36 = vld [vmem:[#allocation2 + $0x630] sm:$0xff]  ;;  %v317_v39 = vld [vmem:[#allocation2 + $0x6a8] sm:$0xff] }
  0xe2   :  { %2185 = vmatprep.subr.bf16.mxu1 %v2184_v49  ;;  %v2204_v49 = vpack.c.bf16 %v247_v42, %v239_v41  ;;  %v310_v38 = vld [vmem:[#allocation2 + $0x670] sm:$0xff]  ;;  %v325_v40 = vld [vmem:[#allocation2 + $0x6e8] sm:$0xff]  ;;  %v319_v41 = vld [vmem:[#allocation2 + $0x6b8] sm:$0xff] }
  0xe3   :  { %v327_v42 = vld [vmem:[#allocation2 + $0x6f8] sm:$0xff] }
  0xe4   :  { %2087 = vmatpush1.bf16.msra.mxu0 %v2086_v55  ;;  %v2106_v55 = vpack.c.bf16 %v244_v47, %v236_v46  ;;  %v316_v46 = vld [vmem:[#allocation2 + $0x6a0] sm:$0xff] }
  0xe5   :  { %2187 = vmatpush1.bf16.msra.mxu1 %v2186_v32  ;;  %2089 = vmatprep.subr.bf16.mxu0 %v2088_v56  ;;  %v2206_v32 = vpack.c.bf16 %v246_v50, %v238_v48  ;;  %v2108_v56 = vpack.c.bf16 %v261_v52, %v253_v51  ;;  %v324_v47 = vld [vmem:[#allocation2 + $0x6e0] sm:$0xff]  ;;  %v318_v48 = vld [vmem:[#allocation2 + $0x6b0] sm:$0xff]  ;;  %v333_v51 = vld [vmem:[#allocation2 + $0x728] sm:$0xff] }
  0xe6   :  { %2189 = vmatprep.subr.bf16.mxu1 %v2188_v60  ;;  %v2208_v60 = vpack.c.bf16 %v263_v54, %v255_v53  ;;  %v326_v50 = vld [vmem:[#allocation2 + $0x6f0] sm:$0xff]  ;;  %v341_v52 = vld [vmem:[#allocation2 + $0x768] sm:$0xff]  ;;  %v335_v53 = vld [vmem:[#allocation2 + $0x738] sm:$0xff] }
  0xe7   :  { %v343_v54 = vld [vmem:[#allocation2 + $0x778] sm:$0xff] }
  0xe8   :  { %2091 = vmatpush1.bf16.msra.mxu0 %v2090_v3  ;;  %v2110_v3 = vpack.c.bf16 %v260_v58, %v252_v57  ;;  %v332_v57 = vld [vmem:[#allocation2 + $0x720] sm:$0xff] }
  0xe9   :  { %2191 = vmatpush1.bf16.msra.mxu1 %v2190_v4  ;;  %2093 = vmatprep.subr.bf16.mxu0 %v2092_v5  ;;  %v2210_v4 = vpack.c.bf16 %v262_v62, %v254_v59  ;;  %v2112_v5 = vpack.c.bf16 %v277_v0, %v269_v63  ;;  %v340_v58 = vld [vmem:[#allocation2 + $0x760] sm:$0xff]  ;;  %v334_v59 = vld [vmem:[#allocation2 + $0x730] sm:$0xff]  ;;  %v349_v63 = vld [vmem:[#allocation2 + $0x7a8] sm:$0xff] }
  0xea   :  { %2193 = vmatprep.subr.bf16.mxu1 %v2192_v9  ;;  %v2212_v9 = vpack.c.bf16 %v279_v2, %v271_v1  ;;  %v342_v62 = vld [vmem:[#allocation2 + $0x770] sm:$0xff]  ;;  %v357_v0 = vld [vmem:[#allocation2 + $0x7e8] sm:$0xff]  ;;  %v351_v1 = vld [vmem:[#allocation2 + $0x7b8] sm:$0xff] }
  0xeb   :  { %v359_v2 = vld [vmem:[#allocation2 + $0x7f8] sm:$0xff] }
  0xec   :  { %2095 = vmatpush1.bf16.msra.mxu0 %v2094_v16  ;;  %v2114_v16 = vpack.c.bf16 %v276_v7, %v268_v6  ;;  %v348_v6 = vld [vmem:[#allocation2 + $0x7a0] sm:$0xff] }
  0xed   :  { %2195 = vmatpush1.bf16.msra.mxu1 %v2194_v17  ;;  %2097 = vmatprep.subr.bf16.mxu0 %v2096_v18  ;;  %v2214_v17 = vpack.c.bf16 %v278_v10, %v270_v8  ;;  %v2116_v18 = vpack.c.bf16 %v293_v13, %v285_v12  ;;  %v356_v7 = vld [vmem:[#allocation2 + $0x7e0] sm:$0xff]  ;;  %v350_v8 = vld [vmem:[#allocation2 + $0x7b0] sm:$0xff]  ;;  %v365_v12 = vld [vmem:[#allocation2 + $0x828] sm:$0xff] }
  0xee   :  { %2197 = vmatprep.subr.bf16.mxu1 %v2196_v23  ;;  %v2216_v23 = vpack.c.bf16 %v295_v15, %v287_v14  ;;  %v358_v10 = vld [vmem:[#allocation2 + $0x7f0] sm:$0xff]  ;;  %v373_v13 = vld [vmem:[#allocation2 + $0x868] sm:$0xff]  ;;  %v367_v14 = vld [vmem:[#allocation2 + $0x838] sm:$0xff] }
  0xef   :  { %v375_v15 = vld [vmem:[#allocation2 + $0x878] sm:$0xff] }
  0xf0   :  { %2099 = vmatpush1.bf16.msra.mxu0 %v2098_v30  ;;  %v2118_v30 = vpack.c.bf16 %v292_v20, %v284_v19  ;;  %v364_v19 = vld [vmem:[#allocation2 + $0x820] sm:$0xff] }
  0xf1   :  { %2199 = vmatpush1.bf16.msra.mxu1 %v2198_v31  ;;  %2101 = vmatprep.subr.bf16.mxu0 %v2100_v33  ;;  %v2218_v31 = vpack.c.bf16 %v294_v24, %v286_v21  ;;  %v2120_v33 = vpack.c.bf16 %v309_v27, %v301_v22  ;;  %v372_v20 = vld [vmem:[#allocation2 + $0x860] sm:$0xff]  ;;  %v366_v21 = vld [vmem:[#allocation2 + $0x830] sm:$0xff]  ;;  %v381_v22 = vld [vmem:[#allocation2 + $0x8a8] sm:$0xff] }
  0xf2   :  { %2201 = vmatprep.subr.bf16.mxu1 %v2200_v37  ;;  %v2220_v37 = vpack.c.bf16 %v311_v29, %v303_v28  ;;  %v374_v24 = vld [vmem:[#allocation2 + $0x870] sm:$0xff]  ;;  %v389_v27 = vld [vmem:[#allocation2 + $0x8e8] sm:$0xff]  ;;  %v383_v28 = vld [vmem:[#allocation2 + $0x8b8] sm:$0xff] }
  0xf3   :  { %v391_v29 = vld [vmem:[#allocation2 + $0x8f8] sm:$0xff] }
  0xf4   :  { %2103 = vmatpush1.bf16.msra.mxu0 %v2102_v43  ;;  %v2122_v43 = vpack.c.bf16 %v308_v35, %v300_v34  ;;  %v380_v34 = vld [vmem:[#allocation2 + $0x8a0] sm:$0xff] }
  0xf5   :  { %2203 = vmatpush1.bf16.msra.mxu1 %v2202_v44  ;;  %2105 = vmatprep.subr.bf16.mxu0 %v2104_v45  ;;  %v2222_v44 = vpack.c.bf16 %v310_v38, %v302_v36  ;;  %v2124_v45 = vpack.c.bf16 %v325_v40, %v317_v39  ;;  %v388_v35 = vld [vmem:[#allocation2 + $0x8e0] sm:$0xff]  ;;  %v382_v36 = vld [vmem:[#allocation2 + $0x8b0] sm:$0xff]  ;;  %v397_v39 = vld [vmem:[#allocation2 + $0x928] sm:$0xff] }
  0xf6   :  { %2205 = vmatprep.subr.bf16.mxu1 %v2204_v49  ;;  %v2224_v49 = vpack.c.bf16 %v327_v42, %v319_v41  ;;  %v390_v38 = vld [vmem:[#allocation2 + $0x8f0] sm:$0xff]  ;;  %v405_v40 = vld [vmem:[#allocation2 + $0x968] sm:$0xff]  ;;  %v399_v41 = vld [vmem:[#allocation2 + $0x938] sm:$0xff] }
  0xf7   :  { %v407_v42 = vld [vmem:[#allocation2 + $0x978] sm:$0xff] }
  0xf8   :  { %2107 = vmatpush1.bf16.msra.mxu0 %v2106_v55  ;;  %v2126_v55 = vpack.c.bf16 %v324_v47, %v316_v46  ;;  %v396_v46 = vld [vmem:[#allocation2 + $0x920] sm:$0xff] }
  0xf9   :  { %2207 = vmatpush1.bf16.msra.mxu1 %v2206_v32  ;;  %2109 = vmatprep.subr.bf16.mxu0 %v2108_v56  ;;  %v2226_v32 = vpack.c.bf16 %v326_v50, %v318_v48  ;;  %v2128_v56 = vpack.c.bf16 %v341_v52, %v333_v51  ;;  %v404_v47 = vld [vmem:[#allocation2 + $0x960] sm:$0xff]  ;;  %v398_v48 = vld [vmem:[#allocation2 + $0x930] sm:$0xff]  ;;  %v413_v51 = vld [vmem:[#allocation2 + $0x9a8] sm:$0xff] }
  0xfa   :  { %2209 = vmatprep.subr.bf16.mxu1 %v2208_v60  ;;  %v2228_v60 = vpack.c.bf16 %v343_v54, %v335_v53  ;;  %v406_v50 = vld [vmem:[#allocation2 + $0x970] sm:$0xff]  ;;  %v421_v52 = vld [vmem:[#allocation2 + $0x9e8] sm:$0xff]  ;;  %v415_v53 = vld [vmem:[#allocation2 + $0x9b8] sm:$0xff] }
  0xfb   :  { %v423_v54 = vld [vmem:[#allocation2 + $0x9f8] sm:$0xff] }
  0xfc   :  { %2111 = vmatpush1.bf16.msra.mxu0 %v2110_v3  ;;  %v2130_v3 = vpack.c.bf16 %v340_v58, %v332_v57  ;;  %v420_v57 = vld [vmem:[#allocation2 + $0x9e0] sm:$0xff]  ;;  %v414_v58 = vld [vmem:[#allocation2 + $0x9b0] sm:$0xff] }
  0xfd   :  { %2211 = vmatpush1.bf16.msra.mxu1 %v2210_v4  ;;  %2113 = vmatprep.subr.bf16.mxu0 %v2112_v5  ;;  %v2230_v4 = vpack.c.bf16 %v342_v62, %v334_v59  ;;  %v2132_v5 = vpack.c.bf16 %v357_v0, %v349_v63  ;;  %v2248_v59 = vpack.c.bf16 %v423_v54, %v415_v53  ;;  %v429_v62 = vld [vmem:[#allocation2 + $0xa28] sm:$0xff]  ;;  %v431_v0 = vld [vmem:[#allocation2 + $0xa38] sm:$0xff] }
  0xfe   :  { %2213 = vmatprep.subr.bf16.mxu1 %v2212_v9  ;;  %v2232_v9 = vpack.c.bf16 %v359_v2, %v351_v1  ;;  %v437_v63 = vld [vmem:[#allocation2 + $0xa68] sm:$0xff]  ;;  %v439_v1 = vld [vmem:[#allocation2 + $0xa78] sm:$0xff] }
 0x100   :  { %2115 = vmatpush1.bf16.msra.mxu0 %v2114_v16  ;;  %v2134_v16 = vpack.c.bf16 %v356_v7, %v348_v6  ;;  %v430_v6 = vld [vmem:[#allocation2 + $0xa30] sm:$0xff]  ;;  %v2252_v7 = vpack.c.bf16 %v439_v1, %v431_v0 }
 0x101   :  { %2215 = vmatpush1.bf16.msra.mxu1 %v2214_v17  ;;  %2117 = vmatprep.subr.bf16.mxu0 %v2116_v18  ;;  %v2234_v17 = vpack.c.bf16 %v358_v10, %v350_v8  ;;  %v2136_v18 = vpack.c.bf16 %v373_v13, %v365_v12  ;;  %v438_v8 = vld [vmem:[#allocation2 + $0xa70] sm:$0xff]  ;;  %v453_v10 = vld [vmem:[#allocation2 + $0xae8] sm:$0xff]  ;;  %v447_v12 = vld [vmem:[#allocation2 + $0xab8] sm:$0xff] }
 0x102   :  { %2217 = vmatprep.subr.bf16.mxu1 %v2216_v23  ;;  %v2236_v23 = vpack.c.bf16 %v375_v15, %v367_v14  ;;  %v455_v13 = vld [vmem:[#allocation2 + $0xaf8] sm:$0xff]  ;;  %v2254_v15 = vpack.c.bf16 %v438_v8, %v430_v6  ;;  %v1179_v6 = vld [vmem:[#allocation7 + $0x108] sm:$0xff]  ;;  %v1165_v8 = vld [vmem:[#allocation7 + $0x98] sm:$0xff] }
 0x104   :  { %2119 = vmatpush1.bf16.msra.mxu0 %v2118_v30  ;;  %v2138_v30 = vpack.c.bf16 %v372_v20, %v364_v19  ;;  %v446_v19 = vld [vmem:[#allocation2 + $0xab0] sm:$0xff]  ;;  %v2256_v20 = vpack.c.bf16 %v455_v13, %v447_v12 }
 0x105   :  { %2219 = vmatpush1.bf16.msra.mxu1 %v2218_v31  ;;  %2121 = vmatprep.subr.bf16.mxu0 %v2120_v33  ;;  %v2238_v31 = vpack.c.bf16 %v374_v24, %v366_v21  ;;  %v2140_v33 = vpack.c.bf16 %v389_v27, %v381_v22  ;;  %v454_v21 = vld [vmem:[#allocation2 + $0xaf0] sm:$0xff]  ;;  %v469_v24 = vld [vmem:[#allocation2 + $0xb68] sm:$0xff]  ;;  %v463_v22 = vld [vmem:[#allocation2 + $0xb38] sm:$0xff] }
 0x106   :  { %2221 = vmatprep.subr.bf16.mxu1 %v2220_v37  ;;  %v2240_v37 = vpack.c.bf16 %v391_v29, %v383_v28  ;;  %v471_v27 = vld [vmem:[#allocation2 + $0xb78] sm:$0xff]  ;;  %v2258_v29 = vpack.c.bf16 %v454_v21, %v446_v19  ;;  %v1181_v19 = vld [vmem:[#allocation7 + $0x118] sm:$0xff]  ;;  %v1167_v21 = vld [vmem:[#allocation7 + $0xa8] sm:$0xff] }
 0x108   :  { %2123 = vmatpush1.bf16.msra.mxu0 %v2122_v43  ;;  %v2142_v43 = vpack.c.bf16 %v388_v35, %v380_v34  ;;  %v462_v34 = vld [vmem:[#allocation2 + $0xb30] sm:$0xff]  ;;  %v2260_v35 = vpack.c.bf16 %v471_v27, %v463_v22 }
 0x109   :  { %2223 = vmatpush1.bf16.msra.mxu1 %v2222_v44  ;;  %2125 = vmatprep.subr.bf16.mxu0 %v2124_v45  ;;  %v2242_v44 = vpack.c.bf16 %v390_v38, %v382_v36  ;;  %v2144_v45 = vpack.c.bf16 %v405_v40, %v397_v39  ;;  %v470_v36 = vld [vmem:[#allocation2 + $0xb70] sm:$0xff]  ;;  %v485_v38 = vld [vmem:[#allocation2 + $0xbe8] sm:$0xff]  ;;  %v479_v39 = vld [vmem:[#allocation2 + $0xbb8] sm:$0xff] }
 0x10a   :  { %2225 = vmatprep.subr.bf16.mxu1 %v2224_v49  ;;  %v2244_v49 = vpack.c.bf16 %v407_v42, %v399_v41  ;;  %v487_v40 = vld [vmem:[#allocation2 + $0xbf8] sm:$0xff]  ;;  %v2262_v42 = vpack.c.bf16 %v470_v36, %v462_v34  ;;  %v1183_v34 = vld [vmem:[#allocation7 + $0x128] sm:$0xff]  ;;  %v1169_v36 = vld [vmem:[#allocation7 + $0xb8] sm:$0xff] }
 0x10c   :  { %2127 = vmatpush1.bf16.msra.mxu0 %v2126_v55  ;;  %v2246_v55 = vpack.c.bf16 %v406_v50, %v398_v48  ;;  %v486_v48 = vld [vmem:[#allocation2 + $0xbf0] sm:$0xff]  ;;  %v501_v50 = vld [vmem:[#allocation2 + $0xc68] sm:$0xff] }
 0x10d   :  { %2227 = vmatpush1.bf16.msra.mxu1 %v2226_v32  ;;  %2129 = vmatprep.subr.bf16.mxu0 %v2128_v56  ;;  %v2148_v32 = vpack.c.bf16 %v421_v52, %v413_v51  ;;  %v412_v56 = vld [vmem:[#allocation2 + $0x9a0] sm:$0xff]  ;;  %v495_v51 = vld [vmem:[#allocation2 + $0xc38] sm:$0xff] }
 0x10e   :  { %2229 = vmatprep.subr.bf16.mxu1 %v2228_v60  ;;  %v422_v60 = vld [vmem:[#allocation2 + $0x9f0] sm:$0xff]  ;;  %v2150_v2 = vpack.c.bf16 %v420_v57, %v412_v56  ;;  %v503_v52 = vld [vmem:[#allocation2 + $0xc78] sm:$0xff] }
 0x10f   :  { %v494_v56 = vld [vmem:[#allocation2 + $0xc30] sm:$0xff]  ;;  %v2268_v57 = vpack.c.bf16 %v503_v52, %v495_v51 }
 0x110   :  { %2131 = vmatpush1.bf16.msra.mxu0 %v2130_v3  ;;  %v2152_v3 = vpack.c.bf16 %v437_v63, %v429_v62  ;;  %v1194_v62 = vld [vmem:[#allocation7 + $0x180] sm:$0xff]  ;;  %v1195_v63 = vld [vmem:[#allocation7 + $0x188] sm:$0xff] }
 0x111   :  { %2231 = vmatpush1.bf16.msra.mxu1 %v2230_v4  ;;  %2133 = vmatprep.subr.bf16.mxu0 %v2132_v5  ;;  %v428_v4 = vld [vmem:[#allocation2 + $0xa20] sm:$0xff] }
 0x112   :  { %2233 = vmatprep.subr.bf16.mxu1 %v2232_v9  ;;  %v436_v5 = vld [vmem:[#allocation2 + $0xa60] sm:$0xff]  ;;  %v445_v9 = vld [vmem:[#allocation2 + $0xaa8] sm:$0xff] }
 0x113   :  { %v2154_v14 = vpack.c.bf16 %v436_v5, %v428_v4  ;;  %v1178_v4 = vld [vmem:[#allocation7 + $0x100] sm:$0xff]  ;;  %v2304_v5 = vpack.c.bf16 %v1195_v63, %v1194_v62 }
 0x114   :  { %2135 = vmatpush1.bf16.msra.mxu0 %v2134_v16  ;;  %v2156_v16 = vpack.c.bf16 %v453_v10, %v445_v9  ;;  %v1196_v9 = vld [vmem:[#allocation7 + $0x190] sm:$0xff]  ;;  %v1197_v10 = vld [vmem:[#allocation7 + $0x198] sm:$0xff]  ;;  %v2306_v13 = vpack.c.bf16 %v1179_v6, %v1178_v4  ;;  %v1174_v4 = vld [vmem:[#allocation7 + $0xe0] sm:$0xff] }
 0x115   :  { %2235 = vmatpush1.bf16.msra.mxu1 %v2234_v17  ;;  %2137 = vmatprep.subr.bf16.mxu0 %v2136_v18  ;;  %v444_v17 = vld [vmem:[#allocation2 + $0xaa0] sm:$0xff]  ;;  %v1206_v6 = vld [vmem:[#allocation7 + $0x1e0] sm:$0xff] }
 0x116   :  { %2237 = vmatprep.subr.bf16.mxu1 %v2236_v23  ;;  %v452_v18 = vld [vmem:[#allocation2 + $0xae0] sm:$0xff]  ;;  %v461_v23 = vld [vmem:[#allocation2 + $0xb28] sm:$0xff] }
 0x117   :  { %919 = vmatmul.mubr.f32.vlgmr.msra.gmra.mrb[2].mxu0 %v2759_v25  ;;  %v2158_v28 = vpack.c.bf16 %v452_v18, %v444_v17  ;;  %v1180_v17 = vld [vmem:[#allocation7 + $0x110] sm:$0xff]  ;;  %v2308_v18 = vpack.c.bf16 %v1197_v10, %v1196_v9 }
 0x118   :  { %2139 = vmatpush1.bf16.msra.mxu0 %v2138_v30  ;;  %1061 = vmatmul.mubr.f32.vlgmr.msra.gmra.mrb[2].mxu1 %v2759_v25  ;;  %v2146_v25 = vpack.c.bf16 %v404_v47, %v396_v46  ;;  %v2160_v30 = vpack.c.bf16 %v469_v24, %v461_v23  ;;  %v478_v46 = vld [vmem:[#allocation2 + $0xbb0] sm:$0xff]  ;;  %v2264_v47 = vpack.c.bf16 %v487_v40, %v479_v39  ;;  %v1198_v23 = vld [vmem:[#allocation7 + $0x1a0] sm:$0xff] }
 0x119   :  { %2239 = vmatpush1.bf16.msra.mxu1 %v2238_v31  ;;  %2141 = vmatprep.subr.bf16.mxu0 %v2140_v33  ;;  %v460_v31 = vld [vmem:[#allocation2 + $0xb20] sm:$0xff]  ;;  %v2266_v54 = vpack.c.bf16 %v486_v48, %v478_v46  ;;  %v1199_v24 = vld [vmem:[#allocation7 + $0x1a8] sm:$0xff]  ;;  %v2310_v27 = vpack.c.bf16 %v1181_v19, %v1180_v17  ;;  %v1170_v46 = vld [vmem:[#allocation7 + $0xc0] sm:$0xff] }
 0x11a   :  { %2241 = vmatprep.subr.bf16.mxu1 %v2240_v37  ;;  %1676 = vmatprep.mubr.msk.f32.mxu0 %vm567_vm0, %v2774_v11  ;;  %v468_v33 = vld [vmem:[#allocation2 + $0xb60] sm:$0xff]  ;;  %v477_v37 = vld [vmem:[#allocation2 + $0xba8] sm:$0xff]  ;;  %v1176_v17 = vld [vmem:[#allocation7 + $0xf0] sm:$0xff] }
 0x11b   :  { %1677 = vmatprep.mubr.msk.f32.mxu1 %vm567_vm0, %v2774_v11  ;;  %v2250_v11 = vpack.c.bf16 %v422_v60, %v414_v58  ;;  %v2162_v41 = vpack.c.bf16 %v468_v33, %v460_v31  ;;  %v502_v58 = vld [vmem:[#allocation2 + $0xc70] sm:$0xff]  ;;  %v1182_v31 = vld [vmem:[#allocation7 + $0x120] sm:$0xff]  ;;  %v2312_v33 = vpack.c.bf16 %v1199_v24, %v1198_v23  ;;  %v1208_v19 = vld [vmem:[#allocation7 + $0x1f0] sm:$0xff] }
 0x11c   :  { %2143 = vmatpush1.bf16.msra.mxu0 %v2142_v43  ;;  %v2164_v43 = vpack.c.bf16 %v485_v38, %v477_v37  ;;  %v1163_v60 = vld [vmem:[#allocation7 + $0x88] sm:$0xff]  ;;  %v2270_v1 = vpack.c.bf16 %v502_v58, %v494_v56  ;;  %v1200_v37 = vld [vmem:[#allocation7 + $0x1b0] sm:$0xff]  ;;  %v1201_v38 = vld [vmem:[#allocation7 + $0x1b8] sm:$0xff] }
 0x11d   :  { %2243 = vmatpush1.bf16.msra.mxu1 %v2242_v44  ;;  %2145 = vmatprep.subr.bf16.mxu0 %v2144_v45  ;;  %v476_v44 = vld [vmem:[#allocation2 + $0xba0] sm:$0xff]  ;;  %v1202_v48 = vld [vmem:[#allocation7 + $0x1c0] sm:$0xff]  ;;  %v1172_v56 = vld [vmem:[#allocation7 + $0xd0] sm:$0xff] }
 0x11e   :  { %2245 = vmatprep.subr.bf16.mxu1 %v2244_v49  ;;  %v484_v45 = vld [vmem:[#allocation2 + $0xbe0] sm:$0xff]  ;;  %v493_v49 = vld [vmem:[#allocation2 + $0xc28] sm:$0xff]  ;;  %v1204_v58 = vld [vmem:[#allocation7 + $0x1d0] sm:$0xff] }
 0x11f   :  { %v2166_v53 = vpack.c.bf16 %v484_v45, %v476_v44  ;;  %v2316_v44 = vpack.c.bf16 %v1201_v38, %v1200_v37  ;;  %v1185_v45 = vld [vmem:[#allocation7 + $0x138] sm:$0xff] }
 0x120   :  { %2147 = vmatpush1.bf16.msra.mxu0 %v2146_v25  ;;  %v2168_v25 = vpack.c.bf16 %v501_v50, %v493_v49  ;;  %v1203_v49 = vld [vmem:[#allocation7 + $0x1c8] sm:$0xff] }
 0x121   :  { %2247 = vmatpush1.bf16.msra.mxu1 %v2246_v55  ;;  %2149 = vmatprep.subr.bf16.mxu0 %v2148_v32  ;;  %v492_v55 = vld [vmem:[#allocation2 + $0xc20] sm:$0xff] }
 0x122   :  { %2249 = vmatprep.subr.bf16.mxu1 %v2248_v59  ;;  %v500_v32 = vld [vmem:[#allocation2 + $0xc60] sm:$0xff]  ;;  %v1162_v59 = vld [vmem:[#allocation7 + $0x80] sm:$0xff] }
 0x123   :  { %v2170_v0 = vpack.c.bf16 %v500_v32, %v492_v55  ;;  %v2320_v55 = vpack.c.bf16 %v1203_v49, %v1202_v48  ;;  %v1187_v32 = vld [vmem:[#allocation7 + $0x148] sm:$0xff] }
 0x124   :  { %2151 = vmatpush1.bf16.msra.mxu0 %v2150_v2  ;;  %v2272_v2 = vpack.c.bf16 %v1163_v60, %v1162_v59  ;;  %v1205_v59 = vld [vmem:[#allocation7 + $0x1d8] sm:$0xff] }
 0x125   :  { %2251 = vmatpush1.bf16.msra.mxu1 %v2250_v11  ;;  %2153 = vmatprep.subr.bf16.mxu0 %v2152_v3  ;;  %v1146_v11 = vld [vmem:[#allocation7] sm:$0xff]  ;;  %v1147_v3 = vld [vmem:[#allocation7 + $0x8] sm:$0xff] }
 0x126   :  { %2253 = vmatprep.subr.bf16.mxu1 %v2252_v7  ;;  %v1164_v7 = vld [vmem:[#allocation7 + $0x90] sm:$0xff]  ;;  %v2274_v12 = vpack.c.bf16 %v1147_v3, %v1146_v11  ;;  %v2324_v11 = vpack.c.bf16 %v1205_v59, %v1204_v58  ;;  %v1189_v3 = vld [vmem:[#allocation7 + $0x158] sm:$0xff] }
 0x127   :  { %v1229_v58 = vld [vmem:[#allocation7 + $0x298] sm:$0xff] }
 0x128   :  { %2155 = vmatpush1.bf16.msra.mxu0 %v2154_v14  ;;  %v2276_v14 = vpack.c.bf16 %v1165_v8, %v1164_v7  ;;  %v1207_v7 = vld [vmem:[#allocation7 + $0x1e8] sm:$0xff] }
 0x129   :  { %2255 = vmatpush1.bf16.msra.mxu1 %v2254_v15  ;;  %2157 = vmatprep.subr.bf16.mxu0 %v2156_v16  ;;  %v1148_v15 = vld [vmem:[#allocation7 + $0x10] sm:$0xff]  ;;  %v1149_v16 = vld [vmem:[#allocation7 + $0x18] sm:$0xff] }
 0x12a   :  { %2257 = vmatprep.subr.bf16.mxu1 %v2256_v20  ;;  %v1166_v20 = vld [vmem:[#allocation7 + $0xa0] sm:$0xff]  ;;  %v2278_v22 = vpack.c.bf16 %v1149_v16, %v1148_v15  ;;  %v2328_v15 = vpack.c.bf16 %v1207_v7, %v1206_v6  ;;  %v1191_v16 = vld [vmem:[#allocation7 + $0x168] sm:$0xff]  ;;  %v1244_v6 = vld [vmem:[#allocation7 + $0x310] sm:$0xff] }
 0x12c   :  { %2159 = vmatpush1.bf16.msra.mxu0 %v2158_v28  ;;  %v2280_v28 = vpack.c.bf16 %v1167_v21, %v1166_v20  ;;  %v1209_v20 = vld [vmem:[#allocation7 + $0x1f8] sm:$0xff] }
 0x12d   :  { %2259 = vmatpush1.bf16.msra.mxu1 %v2258_v29  ;;  %2161 = vmatprep.subr.bf16.mxu0 %v2160_v30  ;;  %v1150_v29 = vld [vmem:[#allocation7 + $0x20] sm:$0xff]  ;;  %v1151_v30 = vld [vmem:[#allocation7 + $0x28] sm:$0xff] }
 0x12e   :  { %2261 = vmatprep.subr.bf16.mxu1 %v2260_v35  ;;  %v1168_v35 = vld [vmem:[#allocation7 + $0xb0] sm:$0xff]  ;;  %v2282_v39 = vpack.c.bf16 %v1151_v30, %v1150_v29  ;;  %v2332_v29 = vpack.c.bf16 %v1209_v20, %v1208_v19  ;;  %v1193_v30 = vld [vmem:[#allocation7 + $0x178] sm:$0xff]  ;;  %v1215_v19 = vld [vmem:[#allocation7 + $0x228] sm:$0xff] }
 0x12f   :  { %v2284_v40 = vpack.c.bf16 %v1169_v36, %v1168_v35  ;;  %v1259_v35 = vld [vmem:[#allocation7 + $0x388] sm:$0xff]  ;;  %v1246_v20 = vld [vmem:[#allocation7 + $0x320] sm:$0xff] }
 0x130   :  { %2163 = vmatpush1.bf16.msra.mxu0 %v2162_v41  ;;  %v1152_v41 = vld [vmem:[#allocation7 + $0x30] sm:$0xff] }
 0x131   :  { %2263 = vmatpush1.bf16.msra.mxu1 %v2262_v42  ;;  %2165 = vmatprep.subr.bf16.mxu0 %v2164_v43  ;;  %v1153_v42 = vld [vmem:[#allocation7 + $0x38] sm:$0xff]  ;;  %v1184_v43 = vld [vmem:[#allocation7 + $0x130] sm:$0xff] }
 0x132   :  { %2265 = vmatprep.subr.bf16.mxu1 %v2264_v47  ;;  %v1171_v47 = vld [vmem:[#allocation7 + $0xc8] sm:$0xff]  ;;  %v2286_v50 = vpack.c.bf16 %v1153_v42, %v1152_v41  ;;  %v2318_v51 = vpack.c.bf16 %v1185_v45, %v1184_v43  ;;  %v516_v41 = vsub.s32 2, %v2747_v61  ;;  %v512_v42 = vsub.s32 1, %v2747_v61 }
 0x133   :  { %v2288_v52 = vpack.c.bf16 %v1171_v47, %v1170_v46  ;;  %v520_v43 = vsub.s32 3, %v2747_v61 }
 0x134   :  { %2167 = vmatpush1.bf16.msra.mxu0 %v2166_v53  ;;  %v1154_v53 = vld [vmem:[#allocation7 + $0x40] sm:$0xff] }
 0x135   :  { %2267 = vmatpush1.bf16.msra.mxu1 %v2266_v54  ;;  %2169 = vmatprep.subr.bf16.mxu0 %v2168_v25  ;;  %v1155_v54 = vld [vmem:[#allocation7 + $0x48] sm:$0xff]  ;;  %v1186_v25 = vld [vmem:[#allocation7 + $0x140] sm:$0xff] }
 0x136   :  { %2269 = vmatprep.subr.bf16.mxu1 %v2268_v57  ;;  %v1173_v57 = vld [vmem:[#allocation7 + $0xd8] sm:$0xff]  ;;  %v2290_v60 = vpack.c.bf16 %v1155_v54, %v1154_v53  ;;  %v2322_v62 = vpack.c.bf16 %v1187_v32, %v1186_v25  ;;  %v1211_v53 = vld [vmem:[#allocation7 + $0x208] sm:$0xff]  ;;  %v1242_v54 = vld [vmem:[#allocation7 + $0x300] sm:$0xff] }
 0x137   :  { %v2292_v63 = vpack.c.bf16 %v1173_v57, %v1172_v56  ;;  %v1243_v56 = vld [vmem:[#allocation7 + $0x308] sm:$0xff]  ;;  %v1228_v57 = vld [vmem:[#allocation7 + $0x290] sm:$0xff] }
 0x138   :  { %2171 = vmatpush1.bf16.msra.mxu0 %v2170_v0  ;;  %v1156_v0 = vld [vmem:[#allocation7 + $0x50] sm:$0xff] }
 0x139   :  { %2271 = vmatpush1.bf16.msra.mxu1 %v2270_v1  ;;  %2273 = vmatprep.subr.bf16.mxu0 %v2272_v2  ;;  %v1157_v1 = vld [vmem:[#allocation7 + $0x58] sm:$0xff]  ;;  %v1188_v2 = vld [vmem:[#allocation7 + $0x150] sm:$0xff] }
 0x13a   :  { %2305 = vmatprep.subr.bf16.mxu1 %v2304_v5  ;;  %v1175_v5 = vld [vmem:[#allocation7 + $0xe8] sm:$0xff]  ;;  %v2294_v8 = vpack.c.bf16 %v1157_v1, %v1156_v0  ;;  %v2326_v9 = vpack.c.bf16 %v1189_v3, %v1188_v2  ;;  %v2340_v3 = vpack.c.bf16 %v1229_v58, %v1228_v57  ;;  %v1252_v57 = vld [vmem:[#allocation7 + $0x350] sm:$0xff] }
 0x13b   :  { %990 = vmatmul.mubr.f32.vlgmr.msra.gmra.mrb[2].mxu0 %v2770_v26  ;;  %v2296_v10 = vpack.c.bf16 %v1175_v5, %v1174_v4  ;;  %v1212_v4 = vld [vmem:[#allocation7 + $0x210] sm:$0xff]  ;;  %v1213_v5 = vld [vmem:[#allocation7 + $0x218] sm:$0xff] }
 0x13c   :  { %1132 = vmatmul.mubr.f32.vlgmr.msra.gmra.mrb[2].mxu1 %v2770_v26  ;;  %2275 = vmatpush3.bf16.msra.mxu0 %v2274_v12  ;;  %v2314_v26 = vpack.c.bf16 %v1183_v34, %v1182_v31  ;;  %v1158_v12 = vld [vmem:[#allocation7 + $0x60] sm:$0xff] }
 0x13d   :  { %2307 = vmatpush3.bf16.msra.mxu1 %v2306_v13  ;;  %2277 = vmatprep.subr.bf16.mxu0 %v2276_v14  ;;  %v1159_v13 = vld [vmem:[#allocation7 + $0x68] sm:$0xff]  ;;  %v1190_v14 = vld [vmem:[#allocation7 + $0x160] sm:$0xff] }
 0x13e   :  { %2309 = vmatprep.subr.bf16.mxu1 %v2308_v18  ;;  %v1177_v18 = vld [vmem:[#allocation7 + $0xf8] sm:$0xff]  ;;  %v2298_v21 = vpack.c.bf16 %v1159_v13, %v1158_v12  ;;  %v2330_v23 = vpack.c.bf16 %v1191_v16, %v1190_v14  ;;  %v1226_v31 = vld [vmem:[#allocation7 + $0x280] sm:$0xff]  ;;  %v1231_v12 = vld [vmem:[#allocation7 + $0x2a8] sm:$0xff] }
 0x13f   :  { %v2300_v24 = vpack.c.bf16 %v1177_v18, %v1176_v17  ;;  %v1258_v34 = vld [vmem:[#allocation7 + $0x380] sm:$0xff]  ;;  %v1263_v14 = vld [vmem:[#allocation7 + $0x3a8] sm:$0xff] }
 0x140   :  { %2279 = vmatpush3.bf16.msra.mxu0 %v2278_v22  ;;  %v1160_v22 = vld [vmem:[#allocation7 + $0x70] sm:$0xff]  ;;  %v1262_v13 = vld [vmem:[#allocation7 + $0x3a0] sm:$0xff] }
 0x141   :  { %2311 = vmatpush3.bf16.msra.mxu1 %v2310_v27  ;;  %2281 = vmatprep.subr.bf16.mxu0 %v2280_v28  ;;  %v1161_v27 = vld [vmem:[#allocation7 + $0x78] sm:$0xff]  ;;  %v1192_v28 = vld [vmem:[#allocation7 + $0x170] sm:$0xff]  ;;  %v1214_v18 = vld [vmem:[#allocation7 + $0x220] sm:$0xff] }
 0x142   :  { %2313 = vmatprep.subr.bf16.mxu1 %v2312_v33  ;;  %v1227_v33 = vld [vmem:[#allocation7 + $0x288] sm:$0xff]  ;;  %v2302_v36 = vpack.c.bf16 %v1161_v27, %v1160_v22  ;;  %v2334_v37 = vpack.c.bf16 %v1193_v30, %v1192_v28  ;;  %v1233_v22 = vld [vmem:[#allocation7 + $0x2b8] sm:$0xff]  ;;  %v1264_v27 = vld [vmem:[#allocation7 + $0x3b0] sm:$0xff] }
 0x143   :  { %v2336_v38 = vpack.c.bf16 %v1227_v33, %v1226_v31  ;;  %v1265_v28 = vld [vmem:[#allocation7 + $0x3b8] sm:$0xff]  ;;  %v1216_v33 = vld [vmem:[#allocation7 + $0x230] sm:$0xff] }
 0x144   :  { %2283 = vmatpush3.bf16.msra.mxu0 %v2282_v39  ;;  %v2368_v39 = vpack.c.bf16 %v1259_v35, %v1258_v34  ;;  %v1217_v34 = vld [vmem:[#allocation7 + $0x238] sm:$0xff]  ;;  %v1248_v35 = vld [vmem:[#allocation7 + $0x330] sm:$0xff] }
 0x145   :  { %2315 = vmatpush3.bf16.msra.mxu1 %v2314_v26  ;;  %2285 = vmatprep.subr.bf16.mxu0 %v2284_v40  ;;  %v508_v26 = vsub.s32 0, %v2747_v61  ;;  %v2795_v40 = vld [vmem:[#allocation5] sm:$0xff] }
 0x146   :  { %2317 = vmatprep.subr.bf16.mxu1 %v2316_v44  ;;  %v517_v45 = vrot.slane %v2795_v40, %v516_v41  ;;  %v513_v46 = vrot.slane %v2795_v40, %v512_v42  ;;  %v521_v47 = vrot.slane %v2795_v40, %v520_v43  ;;  %v1267_v41 = vld [vmem:[#allocation7 + $0x3c8] sm:$0xff]  ;;  %v2350_v42 = vpack.c.bf16 %v1217_v34, %v1216_v33 }
 0x147   :  { %v509_v44 = vrot.slane %v2795_v40, %v508_v26  ;;  %v1266_v26 = vld [vmem:[#allocation7 + $0x3c0] sm:$0xff] }
 0x148   :  { %2287 = vmatpush3.bf16.msra.mxu0 %v2286_v50 }
 0x149   :  { %2319 = vmatpush3.bf16.msra.mxu1 %v2318_v51  ;;  %2289 = vmatprep.subr.bf16.mxu0 %v2288_v52  ;;  %v1210_v52 = vld [vmem:[#allocation7 + $0x200] sm:$0xff] }
 0x14a   :  { %2321 = vmatprep.subr.bf16.mxu1 %v2320_v55  ;;  %v2338_v0 = vpack.c.bf16 %v1211_v53, %v1210_v52  ;;  %v1268_v52 = vld [vmem:[#allocation7 + $0x3d0] sm:$0xff]  ;;  %v1269_v53 = vld [vmem:[#allocation7 + $0x3d8] sm:$0xff] }
 0x14b   :  { %v2388_v58 = vpack.c.bf16 %v1269_v53, %v1268_v52  ;;  %v1567_v52 = vld [vmem:[#allocation10 + $0x28] sm:$0xff] }
 0x14c   :  { %2291 = vmatpush3.bf16.msra.mxu0 %v2290_v60  ;;  %v1260_v60 = vld [vmem:[#allocation7 + $0x390] sm:$0xff] }
 0x14d   :  { %2323 = vmatpush3.bf16.msra.mxu1 %v2322_v62  ;;  %2293 = vmatprep.subr.bf16.mxu0 %v2292_v63  ;;  %v1261_v62 = vld [vmem:[#allocation7 + $0x398] sm:$0xff] }
 0x14e   :  { %2325 = vmatprep.subr.bf16.mxu1 %v2324_v11  ;;  %v2370_v11 = vpack.c.bf16 %v1243_v56, %v1242_v54  ;;  %v1221_v56 = vld [vmem:[#allocation7 + $0x258] sm:$0xff] }
 0x150   :  { %2295 = vmatpush3.bf16.msra.mxu0 %v2294_v8  ;;  %v2372_v8 = vpack.c.bf16 %v1261_v62, %v1260_v60  ;;  %v1238_v60 = vld [vmem:[#allocation7 + $0x2e0] sm:$0xff]  ;;  %v1239_v62 = vld [vmem:[#allocation7 + $0x2e8] sm:$0xff] }
 0x151   :  { %2327 = vmatpush3.bf16.msra.mxu1 %v2326_v9  ;;  %2297 = vmatprep.subr.bf16.mxu0 %v2296_v10  ;;  %v1245_v9 = vld [vmem:[#allocation7 + $0x318] sm:$0xff]  ;;  %v1230_v10 = vld [vmem:[#allocation7 + $0x2a0] sm:$0xff] }
 0x152   :  { %2329 = vmatprep.subr.bf16.mxu1 %v2328_v15  ;;  %v2342_v15 = vpack.c.bf16 %v1213_v5, %v1212_v4  ;;  %v2374_v16 = vpack.c.bf16 %v1245_v9, %v1244_v6  ;;  %v2344_v17 = vpack.c.bf16 %v1231_v12, %v1230_v10  ;;  %v1223_v4 = vld [vmem:[#allocation7 + $0x268] sm:$0xff]  ;;  %v1254_v5 = vld [vmem:[#allocation7 + $0x360] sm:$0xff]  ;;  %v1241_v9 = vld [vmem:[#allocation7 + $0x2f8] sm:$0xff] }
 0x153   :  { %v1272_v10 = vld [vmem:[#allocation7 + $0x3f0] sm:$0xff]  ;;  %v1273_v12 = vld [vmem:[#allocation7 + $0x3f8] sm:$0xff] }
 0x154   :  { %2299 = vmatpush3.bf16.msra.mxu0 %v2298_v21  ;;  %v2376_v21 = vpack.c.bf16 %v1263_v14, %v1262_v13 }
 0x155   :  { %2331 = vmatpush3.bf16.msra.mxu1 %v2330_v23  ;;  %2301 = vmatprep.subr.bf16.mxu0 %v2300_v24  ;;  %v1247_v23 = vld [vmem:[#allocation7 + $0x328] sm:$0xff]  ;;  %v1232_v24 = vld [vmem:[#allocation7 + $0x2b0] sm:$0xff] }
 0x156   :  { %2333 = vmatprep.subr.bf16.mxu1 %v2332_v29  ;;  %v2346_v29 = vpack.c.bf16 %v1215_v19, %v1214_v18  ;;  %v2378_v30 = vpack.c.bf16 %v1247_v23, %v1246_v20  ;;  %v2348_v31 = vpack.c.bf16 %v1233_v22, %v1232_v24  ;;  %v2396_v18 = vpack.c.bf16 %v1273_v12, %v1272_v10  ;;  %v1256_v19 = vld [vmem:[#allocation7 + $0x370] sm:$0xff]  ;;  %v1257_v20 = vld [vmem:[#allocation7 + $0x378] sm:$0xff] }
 0x157   :  { %v2398_v23 = vpack.c.bf16 %v1257_v20, %v1256_v19  ;;  %v524_v24 = vsub.s32 4, %v2747_v61  ;;  %v532_v22 = vsub.s32 6, %v2747_v61 }
 0x158   :  { %2303 = vmatpush3.bf16.msra.mxu0 %v2302_v36  ;;  %v2380_v36 = vpack.c.bf16 %v1265_v28, %v1264_v27  ;;  %v528_v27 = vsub.s32 5, %v2747_v61  ;;  %v536_v28 = vsub.s32 7, %v2747_v61 }
 0x159   :  { %2335 = vmatpush3.bf16.msra.mxu1 %v2334_v37  ;;  %2337 = vmatprep.subr.bf16.mxu0 %v2336_v38  ;;  %v1249_v37 = vld [vmem:[#allocation7 + $0x338] sm:$0xff]  ;;  %v1234_v38 = vld [vmem:[#allocation7 + $0x2c0] sm:$0xff] }
 0x15a   :  { %2369 = vmatprep.subr.bf16.mxu1 %v2368_v39  ;;  %v1235_v39 = vld [vmem:[#allocation7 + $0x2c8] sm:$0xff]  ;;  %v2382_v43 = vpack.c.bf16 %v1249_v37, %v1248_v35  ;;  %v529_v33 = vrot.slane %v2795_v40, %v528_v27  ;;  %v537_v34 = vrot.slane %v2795_v40, %v536_v28 }
 0x1aa   :  { %v707_v48 = vpop.f32.mrb[0].mxu0 }
 0x1ab   :  { %v2424_v49 = vadd.f32 %v707_v48, %v509_v44  ;;  %v849_v50 = vpop.f32.mrb[0].mxu1  ;;  %v709_v51 = vpop.f32.mrb[1].mxu0  ;;  %v2352_v44 = vpack.c.bf16 %v1235_v39, %v1234_v38  ;;  %v2384_v48 = vpack.c.bf16 %v1267_v41, %v1266_v26  ;;  %v1562_v39 = vld [vmem:[#allocation10] sm:$0xff]  ;;  %v1563_v26 = vld [vmem:[#allocation10 + $0x8] sm:$0xff] }
 0x1ac   :  { %v2426_v25 = vadd.f32 %v849_v50, %v517_v45  ;;  %v2425_v55 = vadd.f32 %v709_v51, %v513_v46  ;;  %v851_v32 = vpop.f32.mrb[1].mxu1  ;;  %v1218_v45 = vld [vmem:[#allocation7 + $0x240] sm:$0xff]  ;;  %v1219_v46 = vld [vmem:[#allocation7 + $0x248] sm:$0xff]  ;;  %v1236_v50 = vld [vmem:[#allocation7 + $0x2d0] sm:$0xff] }
 0x1ad   :  { %v2427_v59 = vadd.f32 %v851_v32, %v521_v47  ;;  %v1138_v1 = vmax.f32 %v2424_v49, 0.0  ;;  %v1250_v47 = vld [vmem:[#allocation7 + $0x340] sm:$0xff]  ;;  %v1251_v49 = vld [vmem:[#allocation7 + $0x348] sm:$0xff]  ;;  %v1237_v51 = vld [vmem:[#allocation7 + $0x2d8] sm:$0xff]  ;;  %v2354_v54 = vpack.c.bf16 %v1219_v46, %v1218_v45  ;;  %v2401_v45 = vpack.c.bf16 %v1563_v26, %v1562_v39 }
 0x1ae   :  { %v1139_v63 = vmax.f32 %v2425_v55, 0.0  ;;  %v1140_v7 = vmax.f32 %v2426_v25, 0.0  ;;  %v2386_v25 = vpack.c.bf16 %v1251_v49, %v1250_v47  ;;  %v2356_v55 = vpack.c.bf16 %v1237_v51, %v1236_v50  ;;  %v1220_v32 = vld [vmem:[#allocation7 + $0x250] sm:$0xff]  ;;  %v1565_v49 = vld [vmem:[#allocation10 + $0x18] sm:$0xff]  ;;  %v1566_v51 = vld [vmem:[#allocation10 + $0x20] sm:$0xff] }
 0x1af   :  { %v1141_v2 = vmax.f32 %v2427_v59, 0.0  ;;  %v1253_v59 = vld [vmem:[#allocation7 + $0x358] sm:$0xff]  ;;  %v2407_v53 = vpack.c.bf16 %v1567_v52, %v1566_v51 }
 0x1b0   :  { %1345 = vmatprep.mubr.f32.mxu0 %v1139_v63  ;;  %v1270_v63 = vld [vmem:[#allocation7 + $0x3e0] sm:$0xff] }
 0x1b1   :  { %1415 = vmatprep.mubr.f32.mxu1 %v1141_v2  ;;  %1346 = vmatmul.mubr.f32.vlgmr.msra.gmra.mrb[4].mxu0 %v1138_v1  ;;  %v2358_v1 = vpack.c.bf16 %v1221_v56, %v1220_v32  ;;  %v2390_v2 = vpack.c.bf16 %v1253_v59, %v1252_v57  ;;  %v1570_v32 = vld [vmem:[#allocation10 + $0x40] sm:$0xff]  ;;  %v1571_v56 = vld [vmem:[#allocation10 + $0x48] sm:$0xff]  ;;  %v1573_v59 = vld [vmem:[#allocation10 + $0x58] sm:$0xff] }
 0x1b2   :  { %1416 = vmatmul.mubr.f32.vlgmr.msra.gmra.mrb[4].mxu1 %v1140_v7  ;;  %2339 = vmatpush3.bf16.msra.mxu0 %v2338_v0  ;;  %v1271_v0 = vld [vmem:[#allocation7 + $0x3e8] sm:$0xff]  ;;  %v2413_v57 = vpack.c.bf16 %v1571_v56, %v1570_v32 }
 0x1b3   :  { %2371 = vmatpush3.bf16.msra.mxu1 %v2370_v11  ;;  %2341 = vmatprep.subr.bf16.mxu0 %v2340_v3  ;;  %v2360_v11 = vpack.c.bf16 %v1239_v62, %v1238_v60  ;;  %v1222_v3 = vld [vmem:[#allocation7 + $0x260] sm:$0xff]  ;;  %v2392_v6 = vpack.c.bf16 %v1271_v0, %v1270_v63  ;;  %v1255_v7 = vld [vmem:[#allocation7 + $0x368] sm:$0xff] }
 0x1b4   :  { %2373 = vmatprep.subr.bf16.mxu1 %v2372_v8  ;;  %v1240_v8 = vld [vmem:[#allocation7 + $0x2f0] sm:$0xff]  ;;  %v2362_v13 = vpack.c.bf16 %v1223_v4, %v1222_v3  ;;  %v2394_v14 = vpack.c.bf16 %v1255_v7, %v1254_v5  ;;  %v1574_v62 = vld [vmem:[#allocation10 + $0x60] sm:$0xff]  ;;  %v2633_v3 = vmov 0.0  }
 0x1b5   :  { %v1575_v63 = vld [vmem:[#allocation10 + $0x68] sm:$0xff] }
 0x1b6   :  { %2343 = vmatpush3.bf16.msra.mxu0 %v2342_v15  ;;  %v2364_v15 = vpack.c.bf16 %v1241_v9, %v1240_v8  ;;  %v2419_v0 = vpack.c.bf16 %v1575_v63, %v1574_v62 }
 0x1b7   :  { %2375 = vmatpush3.bf16.msra.mxu1 %v2374_v16  ;;  %2345 = vmatprep.subr.bf16.mxu0 %v2344_v17  ;;  %v1224_v16 = vld [vmem:[#allocation7 + $0x270] sm:$0xff]  ;;  %v1225_v17 = vld [vmem:[#allocation7 + $0x278] sm:$0xff] }
 0x1b8   :  { %2377 = vmatprep.subr.bf16.mxu1 %v2376_v21  ;;  %v2366_v21 = vpack.c.bf16 %v1225_v17, %v1224_v16 }
 0x1ba   :  { %2347 = vmatpush3.bf16.msra.mxu0 %v2346_v29  ;;  %v525_v29 = vrot.slane %v2795_v40, %v524_v24  ;;  %v1679_v24 = vld [vmem:[#allocation11] ss:$0 sm:$0xff] }
 0x1bb   :  { %2379 = vmatpush3.bf16.msra.mxu1 %v2378_v30  ;;  %2349 = vmatprep.subr.bf16.mxu0 %v2348_v31  ;;  %v2631_v30 = vmov 0.0|0.0   ;;  %v533_v31 = vrot.slane %v2795_v40, %v532_v22 }
 0x1bc   :  { %2381 = vmatprep.subr.bf16.mxu1 %v2380_v36 }
 0x1be   :  { %2351 = vmatpush3.bf16.msra.mxu0 %v2350_v42 }
 0x1bf   :  { %2383 = vmatpush3.bf16.msra.mxu1 %v2382_v43  ;;  %2353 = vmatprep.subr.bf16.mxu0 %v2352_v44 }
 0x1c0   :  { %2385 = vmatprep.subr.bf16.mxu1 %v2384_v48  ;;  %v1564_v48 = vld [vmem:[#allocation10 + $0x10] sm:$0xff] }
 0x1c1   :  { %v2404_v40 = vpack.c.bf16 %v1565_v49, %v1564_v48 }
 0x1c2   :  { %2355 = vmatpush3.bf16.msra.mxu0 %v2354_v54  ;;  %v1568_v54 = vld [vmem:[#allocation10 + $0x30] sm:$0xff] }
 0x1c3   :  { %2387 = vmatpush3.bf16.msra.mxu1 %v2386_v25  ;;  %2357 = vmatprep.subr.bf16.mxu0 %v2356_v55  ;;  %v1569_v25 = vld [vmem:[#allocation10 + $0x38] sm:$0xff] }
 0x1c4   :  { %2389 = vmatprep.subr.bf16.mxu1 %v2388_v58  ;;  %v2410_v55 = vpack.c.bf16 %v1569_v25, %v1568_v54  ;;  %v1572_v58 = vld [vmem:[#allocation10 + $0x50] sm:$0xff] }
 0x1c5   :  { %v2416_v60 = vpack.c.bf16 %v1573_v59, %v1572_v58 }
 0x1c6   :  { %2359 = vmatpush3.bf16.msra.mxu0 %v2358_v1  ;;  %v1576_v1 = vld [vmem:[#allocation10 + $0x70] sm:$0xff] }
 0x1c7   :  { %2391 = vmatpush3.bf16.msra.mxu1 %v2390_v2  ;;  %2361 = vmatprep.subr.bf16.mxu0 %v2360_v11  ;;  %v1577_v2 = vld [vmem:[#allocation10 + $0x78] sm:$0xff] }
 0x1c8   :  { %2393 = vmatprep.subr.bf16.mxu1 %v2392_v6  ;;  %v2422_v11 = vpack.c.bf16 %v1577_v2, %v1576_v1  ;;  %v1678_v6 = vld [vmem:[#allocation8] ss:$0 sm:$0xff] }
 0x1ca   :  { %2363 = vmatpush3.bf16.msra.mxu0 %v2362_v13 }
 0x1cb   :  { %2395 = vmatpush3.bf16.msra.mxu1 %v2394_v14  ;;  %2365 = vmatprep.subr.bf16.mxu0 %v2364_v15 }
 0x1cc   :  { %2397 = vmatprep.subr.bf16.mxu1 %v2396_v18 }
 0x1ce   :  { %2367 = vmatpush3.bf16.msra.mxu0 %v2366_v21 }
 0x1cf   :  { %2399 = vmatpush3.bf16.msra.mxu1 %v2398_v23  ;;  %2400 = vmatprep.subr.bf16.mxu0 %v2631_v30 }
 0x20e   :  { %v991_v35 = vpop.f32.mrb[2].mxu0 }
 0x20f   :  { %v2428_v36 = vadd.f32 %v991_v35, %v525_v29  ;;  %v1133_v37 = vpop.f32.mrb[2].mxu1  ;;  %v993_v38 = vpop.f32.mrb[3].mxu0 }
 0x210   :  { %v2430_v41 = vadd.f32 %v1133_v37, %v533_v31  ;;  %v2429_v42 = vadd.f32 %v993_v38, %v529_v33  ;;  %v1135_v43 = vpop.f32.mrb[3].mxu1 }
 0x211   :  { %v2431_v61 = vadd.f32 %v1135_v43, %v537_v34  ;;  %v1142_v46 = vmax.f32 %v2428_v36, 0.0 }
 0x212   :  { %v1143_v44 = vmax.f32 %v2429_v42, 0.0  ;;  %v1144_v50 = vmax.f32 %v2430_v41, 0.0 }
 0x213   :  { %v1145_v47 = vmax.f32 %v2431_v61, 0.0 }
 0x214   :  { %1485 = vmatprep.mubr.f32.mxu0 %v1143_v44 }
 0x215   :  { %1555 = vmatprep.mubr.f32.mxu1 %v1145_v47  ;;  %1486 = vmatmul.mubr.f32.vlgmr.msra.gmra.mrb[6].mxu0 %v1142_v46 }
 0x216   :  { %1556 = vmatmul.mubr.f32.vlgmr.msra.gmra.mrb[6].mxu1 %v1144_v50  ;;  %2402 = vmatpush3.bf16.msra.mxu0 %v2401_v45 }
 0x217   :  { %2403 = vmatprep.subr.bf16.mxu0 %v2631_v30  ;;  %1869 = vmatprep.mubr.msk.f32.mxu0 %vm2632_vm1, %v2633_v3 }
 0x21a   :  { %2405 = vmatpush3.bf16.msra.mxu0 %v2404_v40 }
 0x21b   :  { %2406 = vmatprep.subr.bf16.mxu0 %v2631_v30 }
 0x21e   :  { %2408 = vmatpush3.bf16.msra.mxu0 %v2407_v53 }
 0x21f   :  { %2409 = vmatprep.subr.bf16.mxu0 %v2631_v30 }
 0x222   :  { %2411 = vmatpush3.bf16.msra.mxu0 %v2410_v55 }
 0x223   :  { %2412 = vmatprep.subr.bf16.mxu0 %v2631_v30 }
 0x226   :  { %2414 = vmatpush3.bf16.msra.mxu0 %v2413_v57 }
 0x227   :  { %2415 = vmatprep.subr.bf16.mxu0 %v2631_v30 }
 0x22a   :  { %2417 = vmatpush3.bf16.msra.mxu0 %v2416_v60 }
 0x22b   :  { %2418 = vmatprep.subr.bf16.mxu0 %v2631_v30 }
 0x22e   :  { %2420 = vmatpush3.bf16.msra.mxu0 %v2419_v0 }
 0x22f   :  { %2421 = vmatprep.subr.bf16.mxu0 %v2631_v30 }
 0x232   :  { %2423 = vmatpush3.bf16.msra.mxu0 %v2422_v11 }
 0x284   :  { %v1712_v4 = vpop.f32.mrb[4].mxu0 }
 0x285   :  { %v1747_v5 = vpop.f32.mrb[4].mxu1  ;;  %v1713_v7 = vpop.f32.mrb[5].mxu0 }
 0x286   :  { %v1714_v8 = vadd.f32 %v1713_v7, %v1712_v4  ;;  %v1748_v9 = vpop.f32.mrb[5].mxu1 }
 0x287   :  { %v1749_v10 = vadd.f32 %v1748_v9, %v1747_v5 }
 0x288   :  { %v1348_v12 = vadd.f32 %v1714_v8, %v1678_v6 }
 0x28a   :  { %v1418_v13 = vadd.f32 %v1749_v10, %v1348_v12 }
 0x2e8   :  { %v1782_v14 = vpop.f32.mrb[6].mxu0 }
 0x2e9   :  { %v1817_v15 = vpop.f32.mrb[6].mxu1  ;;  %v1783_v16 = vpop.f32.mrb[7].mxu0 }
 0x2ea   :  { %v1784_v17 = vadd.f32 %v1783_v16, %v1782_v14  ;;  %v1818_v18 = vpop.f32.mrb[7].mxu1 }
 0x2eb   :  { %v1819_v19 = vadd.f32 %v1818_v18, %v1817_v15 }
 0x2ec   :  { %v1488_v20 = vadd.f32 %v1784_v17, %v1418_v13 }
 0x2ee   :  { %v1558_v21 = vadd.f32 %v1819_v19, %v1488_v20 }
 0x2f0   :  { %v1561_v23 = vmax.f32 %v1558_v21, 0.0 }
 0x2f2   :  { %1870 = vmatmul.mubr.f32.vlgmr.msra.gmra.mrb[8].mxu0 %v1561_v23 }
 0x3c5   :  { %v1651_v22 = vpop.f32.mrb[8].mxu0 }
 0x3c6   :  { %v1652_v27 = vadd.f32 %v1679_v24, %v1651_v22  ;;  %v1871_v28 = vpop.f32.mrb[9].mxu0 }
 0x3c8   :  { %1655 = vst [vmem:[#allocation13] sm:$0x3] %v1652_v27 }
 0x3c9   :  { %2599 = shalt.err (!%p2596_p10)
}
 0x3ca   :  { %s2600_s30 = scalar_lea.hbm %s2831_s7, 32 }
 0x3cb   :  { %p2601_p11 = scmp.ne.s32.totalorder %s2831_s7, %s2600_s30  ;;  %p2604_p12 = scmp.lt.u32.totalorder %s2600_s30, %s2831_s7 }
 0x3cd   :  { %p2606_p13 = pnand %p2604_p12, %p2601_p11 }
 0x3cf   :  { %2609 = shalt.err (!%p2606_p13)
}
 0x3d0   :  { %1665 = dma.vmem_to_hbm [thread:$0]  %s1663_s25, 32, %s2831_s7, [#allocation4]  }
 0x3d1   :  { %2618 = dma.done.wait [#allocation4], 32  }
 0x3d2   :  { %2619 = vsyncadd [#allocation4], 4294967264 }
 0x3d3   :  { %1669 = vsyncpa [#allocation3], 1 }
 0x3d4   :  { %1670 = vsyncpa [#allocation6], 1 }
 0x3d5   :  { %1671 = vsyncpa [#allocation9], 1 }
 0x3d6   :  { %1672 = vsyncpa [#allocation12], 1 }
 0x3d7   :  { %1673 = vsyncpa [#allocation4], 1 }

</bundles_post_ra>
